<compile_context>
chip_gen: v7x
topology: tpu7x:2x2x1
jax: 0.10.0
libtpu: 0.0.40
codegen_flags: <defaults>
</compile_context>

<pallas_src>
import numpy as np

import jax
import jax.numpy as jnp
from jax import lax
from jax.experimental import pallas as pl
from jax.experimental.pallas import tpu as pltpu


# Network geometry (fixed by the PyTorch module).
H_IN = 32                # input spatial size
KS = 5                   # conv kernel size
C1 = 6                   # conv1 out channels
H1 = H_IN - KS + 1       # 28: conv1 out spatial
P1 = H1 // 2             # 14: pool1 out spatial
C2 = 16                  # conv2 out channels
H2 = P1 - KS + 1         # 10: conv2 out spatial
P2 = H2 // 2             # 5 : pool2 out spatial
F1, F2, F3 = 120, 84, 10

LANE = 128               # lane tile width
FEAT = P2 * LANE         # 640: padded flattened-feature width (128-aligned rows)
BLOCK_BATCH = 8          # samples per grid step (capped so grid >= 2 steps)

_PACKED_ORDER = (
    "B1", "bias1", "S1e", "R1e",
    "B2", "bias2", "S2e", "R2e",
    "WF1", "bias_fc1", "WF2", "bias_fc2", "WF3", "bias_fc3",
)


# ----------------------------------------------------------------------------
# The single fused kernel (one grid step = one block of B samples)
# ----------------------------------------------------------------------------
def _net_kernel(x_ref,
                b1_ref, bias1_ref, s1_ref, r1_ref,
                b2_ref, bias2_ref, s2_ref, r2_ref,
                wf1_ref, bfc1_ref, wf2_ref, bfc2_ref, wf3_ref, bfc3_ref,
                o_ref,
                p1_scr, p2_scr, feat_scr):
    f32 = jnp.float32
    bf16 = jnp.bfloat16
    B = x_ref.shape[0]

    for b in range(B):                       # static unroll over the sample block
        # ---- conv1 + bias + ReLU: layout (i, j*C1 + co), shape (28, 168) ----
        acc1 = jnp.dot(x_ref[b, 0:H1, :].astype(bf16), b1_ref[0],
                       preferred_element_type=f32) + bias1_ref[...]
        for kh in range(1, KS):
            acc1 = acc1 + jnp.dot(x_ref[b, kh:kh + H1, :].astype(bf16), b1_ref[kh],
                                  preferred_element_type=f32)
        a1 = jnp.maximum(acc1, 0.0)

        # ---- 2x2 max-pool -> (14, 84): roll-max (XLU) + one selection matmul per dir ----
        a1 = jnp.maximum(a1, pltpu.roll(a1, shift=H1 * C1 - C1, axis=1))
        m1 = jnp.dot(a1.astype(bf16), s1_ref[...], preferred_element_type=f32)
        m1 = jnp.maximum(m1, pltpu.roll(m1, shift=H1 - 1, axis=0))
        p1_scr[...] = jnp.dot(r1_ref[...], m1.astype(bf16),
                              preferred_element_type=f32)

        # ---- conv2 + bias + ReLU: layout (i, j*C2 + co), shape (10, 160) ----
        acc2 = jnp.dot(p1_scr[0:H2, :].astype(bf16), b2_ref[0],
                       preferred_element_type=f32) + bias2_ref[...]
        for kh in range(1, KS):
            acc2 = acc2 + jnp.dot(p1_scr[kh:kh + H2, :].astype(bf16), b2_ref[kh],
                                  preferred_element_type=f32)
        a2 = jnp.maximum(acc2, 0.0)

        # ---- 2x2 max-pool -> (5, 128) (lanes 80..127 are exact zeros) ----
        a2 = jnp.maximum(a2, pltpu.roll(a2, shift=H2 * C2 - C2, axis=1))
        m2 = jnp.dot(a2.astype(bf16), s2_ref[...], preferred_element_type=f32)
        m2 = jnp.maximum(m2, pltpu.roll(m2, shift=H2 - 1, axis=0))
        p2_scr[...] = jnp.dot(r2_ref[...], m2.astype(bf16),
                              preferred_element_type=f32)

        # ---- stage flattened features lane-dense at 128-aligned offsets ----
        for p in range(P2):
            feat_scr[b:b + 1, p * LANE:(p + 1) * LANE] = p2_scr[p:p + 1, :]

    # ---- fc stack on the whole (B, .) block ----
    feat = feat_scr[...].astype(bf16)                                    # (B, 640)
    h = jnp.dot(feat, wf1_ref[...], preferred_element_type=f32) + bfc1_ref[...]
    h = jnp.maximum(h, 0.0).astype(bf16)                                 # (B, 120)
    h = jnp.dot(h, wf2_ref[...], preferred_element_type=f32) + bfc2_ref[...]
    h = jnp.maximum(h, 0.0).astype(bf16)                                 # (B, 84)
    out = jnp.dot(h, wf3_ref[...], preferred_element_type=f32) + bfc3_ref[...]
    o_ref[0] = out.astype(o_ref.dtype)                                   # (B, 128) lane-dense


# ----------------------------------------------------------------------------
# Parameter handling
# ----------------------------------------------------------------------------
def init_torch_params(key):
    """Random parameters in PyTorch's native layouts."""
    ks = jax.random.split(key, 10)
    s = 0.1
    return {
        "conv1_w": s * jax.random.normal(ks[0], (C1, 1, KS, KS), jnp.float32),
        "conv1_b": s * jax.random.normal(ks[1], (C1,), jnp.float32),
        "conv2_w": s * jax.random.normal(ks[2], (C2, C1, KS, KS), jnp.float32),
        "conv2_b": s * jax.random.normal(ks[3], (C2,), jnp.float32),
        "fc1_w": s * jax.random.normal(ks[4], (F1, C2 * P2 * P2), jnp.float32),
        "fc1_b": s * jax.random.normal(ks[5], (F1,), jnp.float32),
        "fc2_w": s * jax.random.normal(ks[6], (F2, F1), jnp.float32),
        "fc2_b": s * jax.random.normal(ks[7], (F2,), jnp.float32),
        "fc3_w": s * jax.random.normal(ks[8], (F3, F2), jnp.float32),
        "fc3_b": s * jax.random.normal(ks[9], (F3,), jnp.float32),
    }


def pack_params(tp):
    """One-time host-side repack of PyTorch-layout weights into banded conv
    matrices (bf16), even-block/row pooling selection matrices (bf16), and a
    flatten-folded fc stack; biases stay f32 (added to f32 accumulators)."""
    w1 = np.asarray(tp["conv1_w"], np.float32)   # (6, 1, 5, 5)
    b1 = np.asarray(tp["conv1_b"], np.float32)
    w2 = np.asarray(tp["conv2_w"], np.float32)   # (16, 6, 5, 5)
    b2 = np.asarray(tp["conv2_b"], np.float32)
    wf1 = np.asarray(tp["fc1_w"], np.float32)    # (120, 400)
    bf1 = np.asarray(tp["fc1_b"], np.float32)
    wf2 = np.asarray(tp["fc2_w"], np.float32)    # (84, 120)
    bf2 = np.asarray(tp["fc2_b"], np.float32)
    wf3 = np.asarray(tp["fc3_w"], np.float32)    # (10, 84)
    bf3 = np.asarray(tp["fc3_b"], np.float32)

    # conv1 banded: B1[kh][j_in, j*C1+co] = w1[co, 0, kh, j_in - j]
    B1 = np.zeros((KS, H_IN, H1 * C1), np.float32)
    for kh in range(KS):
        for j in range(H1):
            for kw in range(KS):
                B1[kh, j + kw, j * C1:(j + 1) * C1] = w1[:, 0, kh, kw]
    bias1 = np.tile(b1, H1).reshape(1, H1 * C1)

    # pool1: even-column-block selection (lane dir) and even-row selection (sublane dir).
    S1e = np.zeros((H1 * C1, P1 * C1), np.float32)
    eye1 = np.eye(C1, dtype=np.float32)
    for q in range(P1):
        S1e[(2 * q) * C1:(2 * q + 1) * C1, q * C1:(q + 1) * C1] = eye1
    R1e = np.zeros((P1, H1), np.float32)
    R1e[np.arange(P1), 2 * np.arange(P1)] = 1.0

    # conv2 banded, Cin folded into lanes: B2[kh][q*C1+ci, j*C2+co] = w2[co, ci, kh, q-j]
    B2 = np.zeros((KS, P1 * C1, H2 * C2), np.float32)
    for kh in range(KS):
        for j in range(H2):
            for kw in range(KS):
                q = j + kw
                B2[kh, q * C1:(q + 1) * C1, j * C2:(j + 1) * C2] = w2[:, :, kh, kw].T
    bias2 = np.tile(b2, H2).reshape(1, H2 * C2)

    # pool2: selection padded to 128 output lanes (pad lanes exactly zero).
    S2e = np.zeros((H2 * C2, LANE), np.float32)
    eye2 = np.eye(C2, dtype=np.float32)
    for q in range(P2):
        S2e[(2 * q) * C2:(2 * q + 1) * C2, q * C2:(q + 1) * C2] = eye2
    R2e = np.zeros((P2, H2), np.float32)
    R2e[np.arange(P2), 2 * np.arange(P2)] = 1.0

    # fc1 with PyTorch's view(-1, 16*5*5) flatten (f = co*25 + p*5 + q) folded in,
    # feature lane layout p*128 + q*C2 + co (pad rows p*128+80..127 stay zero).
    WF1 = np.zeros((FEAT, F1), np.float32)
    for p in range(P2):
        for q in range(P2):
            WF1[p * LANE + q * C2:p * LANE + (q + 1) * C2, :] = \
                wf1[:, p * P2 + q::P2 * P2].T

    # fc3 padded to 128 output lanes for a lane-dense store.
    WF3 = np.zeros((F2, LANE), np.float32)
    WF3[:, :F3] = wf3.T
    bfc3 = np.zeros((1, LANE), np.float32)
    bfc3[0, :F3] = bf3

    bf16, f32 = jnp.bfloat16, jnp.float32
    packed = {
        "B1": (B1, bf16), "bias1": (bias1, f32), "S1e": (S1e, bf16), "R1e": (R1e, bf16),
        "B2": (B2, bf16), "bias2": (bias2, f32), "S2e": (S2e, bf16), "R2e": (R2e, bf16),
        "WF1": (WF1, bf16), "bias_fc1": (bf1.reshape(1, F1), f32),
        "WF2": (wf2.T.copy(), bf16), "bias_fc2": (bf2.reshape(1, F2), f32),
        "WF3": (WF3, bf16), "bias_fc3": (bfc3, f32),
    }
    return {k: jnp.asarray(v, d) for k, (v, d) in packed.items()}


# ----------------------------------------------------------------------------
# Forward pass: one pallas_call for the whole network
# ----------------------------------------------------------------------------
def _const_spec(shape):
    nd = len(shape)
    return pl.BlockSpec(shape, lambda i, _nd=nd: (0,) * _nd)


@jax.jit
def net_forward(packed, x_nchw):
    """x_nchw: (N, 1, 32, 32) float32 -> logits (N, 10)."""
    n = x_nchw.shape[0]
    x = x_nchw.reshape(n, H_IN, H_IN).astype(jnp.float32)  # Cin == 1: drop channel dim

    # Block B samples per grid step; keep >= 2 grid steps (v7x has 2 TensorCores).
    B = max(1, min(BLOCK_BATCH, n // 2))
    n_pad = -(-n // B) * B
    if n_pad != n:
        x = jnp.pad(x, ((0, n_pad - n), (0, 0), (0, 0)))
    num_blocks = n_pad // B

    weights = [packed[k] for k in _PACKED_ORDER]
    in_specs = [pl.BlockSpec((B, H_IN, H_IN), lambda i: (i, 0, 0))]
    in_specs += [_const_spec(w.shape) for w in weights]

    out = pl.pallas_call(
        _net_kernel,
        out_shape=jax.ShapeDtypeStruct((num_blocks, B, LANE), jnp.float32),
        grid=(num_blocks,),
        in_specs=in_specs,
        out_specs=pl.BlockSpec((1, B, LANE), lambda i: (i, 0, 0)),
        scratch_shapes=[pltpu.VMEM((P1, P1 * C1), jnp.float32),   # pooled conv1 (14, 84)
                        pltpu.VMEM((P2, LANE), jnp.float32),      # pooled conv2 (5, 128)
                        pltpu.VMEM((B, FEAT), jnp.float32)],      # flattened features
        compiler_params=pltpu.CompilerParams(
            dimension_semantics=("parallel",)),
    )(x, *weights)
    return out.reshape(n_pad, LANE)[:n, :F3]


# ----------------------------------------------------------------------------
# Pure-JAX reference (matches the PyTorch module) for a correctness check
# ----------------------------------------------------------------------------
def net_reference(tp, x_nchw):
    dn = ("NCHW", "OIHW", "NCHW")
    hi = lax.Precision.HIGHEST
    y = lax.conv_general_dilated(x_nchw, tp["conv1_w"], (1, 1), "VALID",
                                 dimension_numbers=dn, precision=hi)
    y = jax.nn.relu(y + tp["conv1_b"][None, :, None, None])
    y = lax.reduce_window(y, -jnp.inf, lax.max, (1, 1, 2, 2), (1, 1, 2, 2), "VALID")
    y = lax.conv_general_dilated(y, tp["conv2_w"], (1, 1), "VALID",
                                 dimension_numbers=dn, precision=hi)
    y = jax.nn.relu(y + tp["conv2_b"][None, :, None, None])
    y = lax.reduce_window(y, -jnp.inf, lax.max, (1, 1, 2, 2), (1, 1, 2, 2), "VALID")
    y = y.reshape(y.shape[0], -1)                      # torch view(-1, 16*5*5)
    y = jax.nn.relu(jnp.dot(y, tp["fc1_w"].T, precision=hi) + tp["fc1_b"])
    y = jax.nn.relu(jnp.dot(y, tp["fc2_w"].T, precision=hi) + tp["fc2_b"])
    return jnp.dot(y, tp["fc3_w"].T, precision=hi) + tp["fc3_b"]


if __name__ == "__main__":
    key = jax.random.PRNGKey(0)
    k_params, k_x = jax.random.split(key)
    torch_params = init_torch_params(k_params)
    packed = pack_params(torch_params)

    # Net requires a 32x32 single-channel input (16*5*5 flatten), batch=2.
    x = jax.random.normal(k_x, (2, 1, H_IN, H_IN), jnp.float32)

    out = net_forward(packed, x)
    jax.block_until_ready(out)
    assert out.shape == (2, F3) and out.dtype == jnp.float32

    ref = net_reference(torch_params, x)
    np.testing.assert_allclose(np.asarray(out), np.asarray(ref),
                               rtol=3e-2, atol=3e-2)
    print("KERNEL_OK")
</pallas_src>

<mosaic_0001>
module attributes {stable_mosaic.version = 11 : i64} {
  func.func @_net_kernel(%arg0: i32, %arg1: memref<1x32x32xf32, #tpu.memory_space<vmem>>, %arg2: memref<5x32x168xbf16, #tpu.memory_space<vmem>>, %arg3: memref<1x168xf32, #tpu.memory_space<vmem>>, %arg4: memref<168x84xbf16, #tpu.memory_space<vmem>>, %arg5: memref<14x28xbf16, #tpu.memory_space<vmem>>, %arg6: memref<5x84x160xbf16, #tpu.memory_space<vmem>>, %arg7: memref<1x160xf32, #tpu.memory_space<vmem>>, %arg8: memref<160x128xbf16, #tpu.memory_space<vmem>>, %arg9: memref<5x10xbf16, #tpu.memory_space<vmem>>, %arg10: memref<640x120xbf16, #tpu.memory_space<vmem>>, %arg11: memref<1x120xf32, #tpu.memory_space<vmem>>, %arg12: memref<120x84xbf16, #tpu.memory_space<vmem>>, %arg13: memref<1x84xf32, #tpu.memory_space<vmem>>, %arg14: memref<84x128xbf16, #tpu.memory_space<vmem>>, %arg15: memref<1x128xf32, #tpu.memory_space<vmem>>, %arg16: memref<1x1x128xf32, #tpu.memory_space<vmem>>, %arg17: memref<14x84xf32, #tpu.memory_space<vmem>>, %arg18: memref<5x128xf32, #tpu.memory_space<vmem>>, %arg19: memref<1x640xf32, #tpu.memory_space<vmem>>) attributes {dimension_semantics = [#tpu.dimension_semantics<parallel>], iteration_bounds = array<i64: 2>, scalar_prefetch = 0 : i64, scratch_operands = 3 : i64, tpu.core_type = #tpu.core_type<tc>, window_params = [{transform_indices = @transform_0, window_bounds = array<i64: 1, 32, 32>}, {pipeline_mode = #tpu.pipeline_mode<synchronous>, transform_indices = @transform_1, window_bounds = array<i64: 5, 32, 168>}, {pipeline_mode = #tpu.pipeline_mode<synchronous>, transform_indices = @transform_2, window_bounds = array<i64: 1, 168>}, {pipeline_mode = #tpu.pipeline_mode<synchronous>, transform_indices = @transform_3, window_bounds = array<i64: 168, 84>}, {pipeline_mode = #tpu.pipeline_mode<synchronous>, transform_indices = @transform_4, window_bounds = array<i64: 14, 28>}, {pipeline_mode = #tpu.pipeline_mode<synchronous>, transform_indices = @transform_5, window_bounds = array<i64: 5, 84, 160>}, {pipeline_mode = #tpu.pipeline_mode<synchronous>, transform_indices = @transform_6, window_bounds = array<i64: 1, 160>}, {pipeline_mode = #tpu.pipeline_mode<synchronous>, transform_indices = @transform_7, window_bounds = array<i64: 160, 128>}, {pipeline_mode = #tpu.pipeline_mode<synchronous>, transform_indices = @transform_8, window_bounds = array<i64: 5, 10>}, {pipeline_mode = #tpu.pipeline_mode<synchronous>, transform_indices = @transform_9, window_bounds = array<i64: 640, 120>}, {pipeline_mode = #tpu.pipeline_mode<synchronous>, transform_indices = @transform_10, window_bounds = array<i64: 1, 120>}, {pipeline_mode = #tpu.pipeline_mode<synchronous>, transform_indices = @transform_11, window_bounds = array<i64: 120, 84>}, {pipeline_mode = #tpu.pipeline_mode<synchronous>, transform_indices = @transform_12, window_bounds = array<i64: 1, 84>}, {pipeline_mode = #tpu.pipeline_mode<synchronous>, transform_indices = @transform_13, window_bounds = array<i64: 84, 128>}, {pipeline_mode = #tpu.pipeline_mode<synchronous>, transform_indices = @transform_14, window_bounds = array<i64: 1, 128>}, {transform_indices = @transform_15, window_bounds = array<i64: 1, 1, 128>}]} {
    %c0 = arith.constant 0 : index
    %c0_0 = arith.constant 0 : index
    %c0_1 = arith.constant 0 : index
    %0 = vector.load %arg1[%c0, %c0_0, %c0_1] : memref<1x32x32xf32, #tpu.memory_space<vmem>>, vector<1x28x32xf32>
    %1 = vector.shape_cast %0 : vector<1x28x32xf32> to vector<28x32xf32>
    %2 = arith.truncf %1 : vector<28x32xf32> to vector<28x32xbf16>
    %c0_2 = arith.constant 0 : index
    %c0_3 = arith.constant 0 : index
    %c0_4 = arith.constant 0 : index
    %3 = vector.load %arg2[%c0_2, %c0_3, %c0_4] : memref<5x32x168xbf16, #tpu.memory_space<vmem>>, vector<1x32x168xbf16>
    %4 = vector.shape_cast %3 : vector<1x32x168xbf16> to vector<32x168xbf16>
    %cst = arith.constant dense<0.000000e+00> : vector<28x168xf32>
    %5 = tpu.matmul %2, %4, %cst {dimension_numbers = #tpu.dot_dimension_numbers<[1], [0], [0], [1], [0, 0, 1, 1], [], []>} : vector<28x32xbf16>, vector<32x168xbf16>, vector<28x168xf32> -> vector<28x168xf32>
    %c0_5 = arith.constant 0 : index
    %c0_6 = arith.constant 0 : index
    %6 = vector.load %arg3[%c0_5, %c0_6] : memref<1x168xf32, #tpu.memory_space<vmem>>, vector<1x168xf32>
    %7 = vector.broadcast %6 : vector<1x168xf32> to vector<28x168xf32>
    %8 = arith.addf %5, %7 : vector<28x168xf32>
    %c0_7 = arith.constant 0 : index
    %c1 = arith.constant 1 : index
    %c0_8 = arith.constant 0 : index
    %9 = vector.load %arg1[%c0_7, %c1, %c0_8] : memref<1x32x32xf32, #tpu.memory_space<vmem>>, vector<1x28x32xf32>
    %10 = vector.shape_cast %9 : vector<1x28x32xf32> to vector<28x32xf32>
    %11 = arith.truncf %10 : vector<28x32xf32> to vector<28x32xbf16>
    %c1_9 = arith.constant 1 : index
    %c0_10 = arith.constant 0 : index
    %c0_11 = arith.constant 0 : index
    %12 = vector.load %arg2[%c1_9, %c0_10, %c0_11] : memref<5x32x168xbf16, #tpu.memory_space<vmem>>, vector<1x32x168xbf16>
    %13 = vector.shape_cast %12 : vector<1x32x168xbf16> to vector<32x168xbf16>
    %cst_12 = arith.constant dense<0.000000e+00> : vector<28x168xf32>
    %14 = tpu.matmul %11, %13, %cst_12 {dimension_numbers = #tpu.dot_dimension_numbers<[1], [0], [0], [1], [0, 0, 1, 1], [], []>} : vector<28x32xbf16>, vector<32x168xbf16>, vector<28x168xf32> -> vector<28x168xf32>
    %15 = arith.addf %8, %14 : vector<28x168xf32>
    %c0_13 = arith.constant 0 : index
    %c2 = arith.constant 2 : index
    %c0_14 = arith.constant 0 : index
    %16 = vector.load %arg1[%c0_13, %c2, %c0_14] : memref<1x32x32xf32, #tpu.memory_space<vmem>>, vector<1x28x32xf32>
    %17 = vector.shape_cast %16 : vector<1x28x32xf32> to vector<28x32xf32>
    %18 = arith.truncf %17 : vector<28x32xf32> to vector<28x32xbf16>
    %c2_15 = arith.constant 2 : index
    %c0_16 = arith.constant 0 : index
    %c0_17 = arith.constant 0 : index
    %19 = vector.load %arg2[%c2_15, %c0_16, %c0_17] : memref<5x32x168xbf16, #tpu.memory_space<vmem>>, vector<1x32x168xbf16>
    %20 = vector.shape_cast %19 : vector<1x32x168xbf16> to vector<32x168xbf16>
    %cst_18 = arith.constant dense<0.000000e+00> : vector<28x168xf32>
    %21 = tpu.matmul %18, %20, %cst_18 {dimension_numbers = #tpu.dot_dimension_numbers<[1], [0], [0], [1], [0, 0, 1, 1], [], []>} : vector<28x32xbf16>, vector<32x168xbf16>, vector<28x168xf32> -> vector<28x168xf32>
    %22 = arith.addf %15, %21 : vector<28x168xf32>
    %c0_19 = arith.constant 0 : index
    %c3 = arith.constant 3 : index
    %c0_20 = arith.constant 0 : index
    %23 = vector.load %arg1[%c0_19, %c3, %c0_20] : memref<1x32x32xf32, #tpu.memory_space<vmem>>, vector<1x28x32xf32>
    %24 = vector.shape_cast %23 : vector<1x28x32xf32> to vector<28x32xf32>
    %25 = arith.truncf %24 : vector<28x32xf32> to vector<28x32xbf16>
    %c3_21 = arith.constant 3 : index
    %c0_22 = arith.constant 0 : index
    %c0_23 = arith.constant 0 : index
    %26 = vector.load %arg2[%c3_21, %c0_22, %c0_23] : memref<5x32x168xbf16, #tpu.memory_space<vmem>>, vector<1x32x168xbf16>
    %27 = vector.shape_cast %26 : vector<1x32x168xbf16> to vector<32x168xbf16>
    %cst_24 = arith.constant dense<0.000000e+00> : vector<28x168xf32>
    %28 = tpu.matmul %25, %27, %cst_24 {dimension_numbers = #tpu.dot_dimension_numbers<[1], [0], [0], [1], [0, 0, 1, 1], [], []>} : vector<28x32xbf16>, vector<32x168xbf16>, vector<28x168xf32> -> vector<28x168xf32>
    %29 = arith.addf %22, %28 : vector<28x168xf32>
    %c0_25 = arith.constant 0 : index
    %c4 = arith.constant 4 : index
    %c0_26 = arith.constant 0 : index
    %30 = vector.load %arg1[%c0_25, %c4, %c0_26] : memref<1x32x32xf32, #tpu.memory_space<vmem>>, vector<1x28x32xf32>
    %31 = vector.shape_cast %30 : vector<1x28x32xf32> to vector<28x32xf32>
    %32 = arith.truncf %31 : vector<28x32xf32> to vector<28x32xbf16>
    %c4_27 = arith.constant 4 : index
    %c0_28 = arith.constant 0 : index
    %c0_29 = arith.constant 0 : index
    %33 = vector.load %arg2[%c4_27, %c0_28, %c0_29] : memref<5x32x168xbf16, #tpu.memory_space<vmem>>, vector<1x32x168xbf16>
    %34 = vector.shape_cast %33 : vector<1x32x168xbf16> to vector<32x168xbf16>
    %cst_30 = arith.constant dense<0.000000e+00> : vector<28x168xf32>
    %35 = tpu.matmul %32, %34, %cst_30 {dimension_numbers = #tpu.dot_dimension_numbers<[1], [0], [0], [1], [0, 0, 1, 1], [], []>} : vector<28x32xbf16>, vector<32x168xbf16>, vector<28x168xf32> -> vector<28x168xf32>
    %36 = arith.addf %29, %35 : vector<28x168xf32>
    %cst_31 = arith.constant 0.000000e+00 : f32
    %37 = vector.broadcast %cst_31 : f32 to vector<28x168xf32>
    %38 = arith.maximumf %36, %37 : vector<28x168xf32>
    %c162_i32 = arith.constant 162 : i32
    %39 = tpu.dynamic_rotate %38 by %c162_i32 dim 1 : vector<28x168xf32>, i32 -> vector<28x168xf32>
    %40 = arith.maximumf %38, %39 : vector<28x168xf32>
    %41 = arith.truncf %40 : vector<28x168xf32> to vector<28x168xbf16>
    %c0_32 = arith.constant 0 : index
    %c0_33 = arith.constant 0 : index
    %42 = vector.load %arg4[%c0_32, %c0_33] : memref<168x84xbf16, #tpu.memory_space<vmem>>, vector<168x84xbf16>
    %cst_34 = arith.constant dense<0.000000e+00> : vector<28x84xf32>
    %43 = tpu.matmul %41, %42, %cst_34 {dimension_numbers = #tpu.dot_dimension_numbers<[1], [0], [0], [1], [0, 0, 1, 1], [], []>} : vector<28x168xbf16>, vector<168x84xbf16>, vector<28x84xf32> -> vector<28x84xf32>
    %c27_i32 = arith.constant 27 : i32
    %44 = tpu.dynamic_rotate %43 by %c27_i32 dim 0 : vector<28x84xf32>, i32 -> vector<28x84xf32>
    %45 = arith.maximumf %43, %44 : vector<28x84xf32>
    %c0_35 = arith.constant 0 : index
    %c0_36 = arith.constant 0 : index
    %46 = vector.load %arg5[%c0_35, %c0_36] : memref<14x28xbf16, #tpu.memory_space<vmem>>, vector<14x28xbf16>
    %47 = arith.truncf %45 : vector<28x84xf32> to vector<28x84xbf16>
    %cst_37 = arith.constant dense<0.000000e+00> : vector<14x84xf32>
    %48 = tpu.matmul %46, %47, %cst_37 {dimension_numbers = #tpu.dot_dimension_numbers<[1], [0], [0], [1], [0, 0, 1, 1], [], []>} : vector<14x28xbf16>, vector<28x84xbf16>, vector<14x84xf32> -> vector<14x84xf32>
    %c0_38 = arith.constant 0 : index
    %c0_39 = arith.constant 0 : index
    %49 = vector.load %arg17[%c0_38, %c0_39] : memref<14x84xf32, #tpu.memory_space<vmem>>, vector<14x84xf32>
    tpu.vector_store %arg17[%c0_38, %c0_39], %48 {strides = array<i32>} : memref<14x84xf32, #tpu.memory_space<vmem>>, vector<14x84xf32>,
    %c0_40 = arith.constant 0 : index
    %c0_41 = arith.constant 0 : index
    %50 = vector.load %arg17[%c0_40, %c0_41] : memref<14x84xf32, #tpu.memory_space<vmem>>, vector<10x84xf32>
    %51 = arith.truncf %50 : vector<10x84xf32> to vector<10x84xbf16>
    %c0_42 = arith.constant 0 : index
    %c0_43 = arith.constant 0 : index
    %c0_44 = arith.constant 0 : index
    %52 = vector.load %arg6[%c0_42, %c0_43, %c0_44] : memref<5x84x160xbf16, #tpu.memory_space<vmem>>, vector<1x84x160xbf16>
    %53 = vector.shape_cast %52 : vector<1x84x160xbf16> to vector<84x160xbf16>
    %cst_45 = arith.constant dense<0.000000e+00> : vector<10x160xf32>
    %54 = tpu.matmul %51, %53, %cst_45 {dimension_numbers = #tpu.dot_dimension_numbers<[1], [0], [0], [1], [0, 0, 1, 1], [], []>} : vector<10x84xbf16>, vector<84x160xbf16>, vector<10x160xf32> -> vector<10x160xf32>
    %c0_46 = arith.constant 0 : index
    %c0_47 = arith.constant 0 : index
    %55 = vector.load %arg7[%c0_46, %c0_47] : memref<1x160xf32, #tpu.memory_space<vmem>>, vector<1x160xf32>
    %56 = vector.broadcast %55 : vector<1x160xf32> to vector<10x160xf32>
    %57 = arith.addf %54, %56 : vector<10x160xf32>
    %c1_48 = arith.constant 1 : index
    %c0_49 = arith.constant 0 : index
    %58 = vector.load %arg17[%c1_48, %c0_49] : memref<14x84xf32, #tpu.memory_space<vmem>>, vector<10x84xf32>
    %59 = arith.truncf %58 : vector<10x84xf32> to vector<10x84xbf16>
    %c1_50 = arith.constant 1 : index
    %c0_51 = arith.constant 0 : index
    %c0_52 = arith.constant 0 : index
    %60 = vector.load %arg6[%c1_50, %c0_51, %c0_52] : memref<5x84x160xbf16, #tpu.memory_space<vmem>>, vector<1x84x160xbf16>
    %61 = vector.shape_cast %60 : vector<1x84x160xbf16> to vector<84x160xbf16>
    %cst_53 = arith.constant dense<0.000000e+00> : vector<10x160xf32>
    %62 = tpu.matmul %59, %61, %cst_53 {dimension_numbers = #tpu.dot_dimension_numbers<[1], [0], [0], [1], [0, 0, 1, 1], [], []>} : vector<10x84xbf16>, vector<84x160xbf16>, vector<10x160xf32> -> vector<10x160xf32>
    %63 = arith.addf %57, %62 : vector<10x160xf32>
    %c2_54 = arith.constant 2 : index
    %c0_55 = arith.constant 0 : index
    %64 = vector.load %arg17[%c2_54, %c0_55] : memref<14x84xf32, #tpu.memory_space<vmem>>, vector<10x84xf32>
    %65 = arith.truncf %64 : vector<10x84xf32> to vector<10x84xbf16>
    %c2_56 = arith.constant 2 : index
    %c0_57 = arith.constant 0 : index
    %c0_58 = arith.constant 0 : index
    %66 = vector.load %arg6[%c2_56, %c0_57, %c0_58] : memref<5x84x160xbf16, #tpu.memory_space<vmem>>, vector<1x84x160xbf16>
    %67 = vector.shape_cast %66 : vector<1x84x160xbf16> to vector<84x160xbf16>
    %cst_59 = arith.constant dense<0.000000e+00> : vector<10x160xf32>
    %68 = tpu.matmul %65, %67, %cst_59 {dimension_numbers = #tpu.dot_dimension_numbers<[1], [0], [0], [1], [0, 0, 1, 1], [], []>} : vector<10x84xbf16>, vector<84x160xbf16>, vector<10x160xf32> -> vector<10x160xf32>
    %69 = arith.addf %63, %68 : vector<10x160xf32>
    %c3_60 = arith.constant 3 : index
    %c0_61 = arith.constant 0 : index
    %70 = vector.load %arg17[%c3_60, %c0_61] : memref<14x84xf32, #tpu.memory_space<vmem>>, vector<10x84xf32>
    %71 = arith.truncf %70 : vector<10x84xf32> to vector<10x84xbf16>
    %c3_62 = arith.constant 3 : index
    %c0_63 = arith.constant 0 : index
    %c0_64 = arith.constant 0 : index
    %72 = vector.load %arg6[%c3_62, %c0_63, %c0_64] : memref<5x84x160xbf16, #tpu.memory_space<vmem>>, vector<1x84x160xbf16>
    %73 = vector.shape_cast %72 : vector<1x84x160xbf16> to vector<84x160xbf16>
    %cst_65 = arith.constant dense<0.000000e+00> : vector<10x160xf32>
    %74 = tpu.matmul %71, %73, %cst_65 {dimension_numbers = #tpu.dot_dimension_numbers<[1], [0], [0], [1], [0, 0, 1, 1], [], []>} : vector<10x84xbf16>, vector<84x160xbf16>, vector<10x160xf32> -> vector<10x160xf32>
    %75 = arith.addf %69, %74 : vector<10x160xf32>
    %c4_66 = arith.constant 4 : index
    %c0_67 = arith.constant 0 : index
    %76 = vector.load %arg17[%c4_66, %c0_67] : memref<14x84xf32, #tpu.memory_space<vmem>>, vector<10x84xf32>
    %77 = arith.truncf %76 : vector<10x84xf32> to vector<10x84xbf16>
    %c4_68 = arith.constant 4 : index
    %c0_69 = arith.constant 0 : index
    %c0_70 = arith.constant 0 : index
    %78 = vector.load %arg6[%c4_68, %c0_69, %c0_70] : memref<5x84x160xbf16, #tpu.memory_space<vmem>>, vector<1x84x160xbf16>
    %79 = vector.shape_cast %78 : vector<1x84x160xbf16> to vector<84x160xbf16>
    %cst_71 = arith.constant dense<0.000000e+00> : vector<10x160xf32>
    %80 = tpu.matmul %77, %79, %cst_71 {dimension_numbers = #tpu.dot_dimension_numbers<[1], [0], [0], [1], [0, 0, 1, 1], [], []>} : vector<10x84xbf16>, vector<84x160xbf16>, vector<10x160xf32> -> vector<10x160xf32>
    %81 = arith.addf %75, %80 : vector<10x160xf32>
    %cst_72 = arith.constant 0.000000e+00 : f32
    %82 = vector.broadcast %cst_72 : f32 to vector<10x160xf32>
    %83 = arith.maximumf %81, %82 : vector<10x160xf32>
    %c144_i32 = arith.constant 144 : i32
    %84 = tpu.dynamic_rotate %83 by %c144_i32 dim 1 : vector<10x160xf32>, i32 -> vector<10x160xf32>
    %85 = arith.maximumf %83, %84 : vector<10x160xf32>
    %86 = arith.truncf %85 : vector<10x160xf32> to vector<10x160xbf16>
    %c0_73 = arith.constant 0 : index
    %c0_74 = arith.constant 0 : index
    %87 = vector.load %arg8[%c0_73, %c0_74] : memref<160x128xbf16, #tpu.memory_space<vmem>>, vector<160x128xbf16>
    %cst_75 = arith.constant dense<0.000000e+00> : vector<10x128xf32>
    %88 = tpu.matmul %86, %87, %cst_75 {dimension_numbers = #tpu.dot_dimension_numbers<[1], [0], [0], [1], [0, 0, 1, 1], [], []>} : vector<10x160xbf16>, vector<160x128xbf16>, vector<10x128xf32> -> vector<10x128xf32>
    %c9_i32 = arith.constant 9 : i32
    %89 = tpu.dynamic_rotate %88 by %c9_i32 dim 0 : vector<10x128xf32>, i32 -> vector<10x128xf32>
    %90 = arith.maximumf %88, %89 : vector<10x128xf32>
    %c0_76 = arith.constant 0 : index
    %c0_77 = arith.constant 0 : index
    %91 = vector.load %arg9[%c0_76, %c0_77] : memref<5x10xbf16, #tpu.memory_space<vmem>>, vector<5x10xbf16>
    %92 = arith.truncf %90 : vector<10x128xf32> to vector<10x128xbf16>
    %cst_78 = arith.constant dense<0.000000e+00> : vector<5x128xf32>
    %93 = tpu.matmul %91, %92, %cst_78 {dimension_numbers = #tpu.dot_dimension_numbers<[1], [0], [0], [1], [0, 0, 1, 1], [], []>} : vector<5x10xbf16>, vector<10x128xbf16>, vector<5x128xf32> -> vector<5x128xf32>
    %c0_79 = arith.constant 0 : index
    %c0_80 = arith.constant 0 : index
    %94 = vector.load %arg18[%c0_79, %c0_80] : memref<5x128xf32, #tpu.memory_space<vmem>>, vector<5x128xf32>
    tpu.vector_store %arg18[%c0_79, %c0_80], %93 {strides = array<i32>} : memref<5x128xf32, #tpu.memory_space<vmem>>, vector<5x128xf32>,
    %c0_81 = arith.constant 0 : index
    %c0_82 = arith.constant 0 : index
    %95 = vector.load %arg18[%c0_81, %c0_82] : memref<5x128xf32, #tpu.memory_space<vmem>>, vector<1x128xf32>
    %c0_83 = arith.constant 0 : index
    %c0_84 = arith.constant 0 : index
    %96 = vector.load %arg19[%c0_83, %c0_84] : memref<1x640xf32, #tpu.memory_space<vmem>>, vector<1x128xf32>
    tpu.vector_store %arg19[%c0_83, %c0_84], %95 {strides = array<i32>} : memref<1x640xf32, #tpu.memory_space<vmem>>, vector<1x128xf32>,
    %c1_85 = arith.constant 1 : index
    %c0_86 = arith.constant 0 : index
    %97 = vector.load %arg18[%c1_85, %c0_86] : memref<5x128xf32, #tpu.memory_space<vmem>>, vector<1x128xf32>
    %c0_87 = arith.constant 0 : index
    %c128 = arith.constant 128 : index
    %98 = vector.load %arg19[%c0_87, %c128] : memref<1x640xf32, #tpu.memory_space<vmem>>, vector<1x128xf32>
    tpu.vector_store %arg19[%c0_87, %c128], %97 {strides = array<i32>} : memref<1x640xf32, #tpu.memory_space<vmem>>, vector<1x128xf32>,
    %c2_88 = arith.constant 2 : index
    %c0_89 = arith.constant 0 : index
    %99 = vector.load %arg18[%c2_88, %c0_89] : memref<5x128xf32, #tpu.memory_space<vmem>>, vector<1x128xf32>
    %c0_90 = arith.constant 0 : index
    %c256 = arith.constant 256 : index
    %100 = vector.load %arg19[%c0_90, %c256] : memref<1x640xf32, #tpu.memory_space<vmem>>, vector<1x128xf32>
    tpu.vector_store %arg19[%c0_90, %c256], %99 {strides = array<i32>} : memref<1x640xf32, #tpu.memory_space<vmem>>, vector<1x128xf32>,
    %c3_91 = arith.constant 3 : index
    %c0_92 = arith.constant 0 : index
    %101 = vector.load %arg18[%c3_91, %c0_92] : memref<5x128xf32, #tpu.memory_space<vmem>>, vector<1x128xf32>
    %c0_93 = arith.constant 0 : index
    %c384 = arith.constant 384 : index
    %102 = vector.load %arg19[%c0_93, %c384] : memref<1x640xf32, #tpu.memory_space<vmem>>, vector<1x128xf32>
    tpu.vector_store %arg19[%c0_93, %c384], %101 {strides = array<i32>} : memref<1x640xf32, #tpu.memory_space<vmem>>, vector<1x128xf32>,
    %c4_94 = arith.constant 4 : index
    %c0_95 = arith.constant 0 : index
    %103 = vector.load %arg18[%c4_94, %c0_95] : memref<5x128xf32, #tpu.memory_space<vmem>>, vector<1x128xf32>
    %c0_96 = arith.constant 0 : index
    %c512 = arith.constant 512 : index
    %104 = vector.load %arg19[%c0_96, %c512] : memref<1x640xf32, #tpu.memory_space<vmem>>, vector<1x128xf32>
    tpu.vector_store %arg19[%c0_96, %c512], %103 {strides = array<i32>} : memref<1x640xf32, #tpu.memory_space<vmem>>, vector<1x128xf32>,
    %c0_97 = arith.constant 0 : index
    %c0_98 = arith.constant 0 : index
    %105 = vector.load %arg19[%c0_97, %c0_98] : memref<1x640xf32, #tpu.memory_space<vmem>>, vector<1x640xf32>
    %106 = arith.truncf %105 : vector<1x640xf32> to vector<1x640xbf16>
    %c0_99 = arith.constant 0 : index
    %c0_100 = arith.constant 0 : index
    %107 = vector.load %arg10[%c0_99, %c0_100] : memref<640x120xbf16, #tpu.memory_space<vmem>>, vector<640x120xbf16>
    %cst_101 = arith.constant dense<0.000000e+00> : vector<1x120xf32>
    %108 = tpu.matmul %106, %107, %cst_101 {dimension_numbers = #tpu.dot_dimension_numbers<[1], [0], [0], [1], [0, 0, 1, 1], [], []>} : vector<1x640xbf16>, vector<640x120xbf16>, vector<1x120xf32> -> vector<1x120xf32>
    %c0_102 = arith.constant 0 : index
    %c0_103 = arith.constant 0 : index
    %109 = vector.load %arg11[%c0_102, %c0_103] : memref<1x120xf32, #tpu.memory_space<vmem>>, vector<1x120xf32>
    %110 = arith.addf %108, %109 : vector<1x120xf32>
    %cst_104 = arith.constant 0.000000e+00 : f32
    %111 = vector.broadcast %cst_104 : f32 to vector<1x120xf32>
    %112 = arith.maximumf %110, %111 : vector<1x120xf32>
    %113 = arith.truncf %112 : vector<1x120xf32> to vector<1x120xbf16>
    %c0_105 = arith.constant 0 : index
    %c0_106 = arith.constant 0 : index
    %114 = vector.load %arg12[%c0_105, %c0_106] : memref<120x84xbf16, #tpu.memory_space<vmem>>, vector<120x84xbf16>
    %cst_107 = arith.constant dense<0.000000e+00> : vector<1x84xf32>
    %115 = tpu.matmul %113, %114, %cst_107 {dimension_numbers = #tpu.dot_dimension_numbers<[1], [0], [0], [1], [0, 0, 1, 1], [], []>} : vector<1x120xbf16>, vector<120x84xbf16>, vector<1x84xf32> -> vector<1x84xf32>
    %c0_108 = arith.constant 0 : index
    %c0_109 = arith.constant 0 : index
    %116 = vector.load %arg13[%c0_108, %c0_109] : memref<1x84xf32, #tpu.memory_space<vmem>>, vector<1x84xf32>
    %117 = arith.addf %115, %116 : vector<1x84xf32>
    %cst_110 = arith.constant 0.000000e+00 : f32
    %118 = vector.broadcast %cst_110 : f32 to vector<1x84xf32>
    %119 = arith.maximumf %117, %118 : vector<1x84xf32>
    %120 = arith.truncf %119 : vector<1x84xf32> to vector<1x84xbf16>
    %c0_111 = arith.constant 0 : index
    %c0_112 = arith.constant 0 : index
    %121 = vector.load %arg14[%c0_111, %c0_112] : memref<84x128xbf16, #tpu.memory_space<vmem>>, vector<84x128xbf16>
    %cst_113 = arith.constant dense<0.000000e+00> : vector<1x128xf32>
    %122 = tpu.matmul %120, %121, %cst_113 {dimension_numbers = #tpu.dot_dimension_numbers<[1], [0], [0], [1], [0, 0, 1, 1], [], []>} : vector<1x84xbf16>, vector<84x128xbf16>, vector<1x128xf32> -> vector<1x128xf32>
    %c0_114 = arith.constant 0 : index
    %c0_115 = arith.constant 0 : index
    %123 = vector.load %arg15[%c0_114, %c0_115] : memref<1x128xf32, #tpu.memory_space<vmem>>, vector<1x128xf32>
    %124 = arith.addf %122, %123 : vector<1x128xf32>
    %c0_116 = arith.constant 0 : index
    %c0_117 = arith.constant 0 : index
    %c0_118 = arith.constant 0 : index
    %125 = vector.load %arg16[%c0_116, %c0_117, %c0_118] : memref<1x1x128xf32, #tpu.memory_space<vmem>>, vector<1x1x128xf32>
    %126 = vector.shape_cast %125 : vector<1x1x128xf32> to vector<1x128xf32>
    %127 = vector.shape_cast %124 : vector<1x128xf32> to vector<1x1x128xf32>
    tpu.vector_store %arg16[%c0_116, %c0_117, %c0_118], %127 {strides = array<i32>} : memref<1x1x128xf32, #tpu.memory_space<vmem>>, vector<1x1x128xf32>,
    return
  }
  func.func @transform_0(%arg0: i32) -> (i32, i32, i32) {
    %c0_i32 = arith.constant 0 : i32
    %c0_i32_0 = arith.constant 0 : i32
    %c0_i32_1 = arith.constant 0 : i32
    return %arg0, %c0_i32, %c0_i32_0 : i32, i32, i32
  }
  func.func @transform_1(%arg0: i32) -> (i32, i32, i32) {
    %c0_i32 = arith.constant 0 : i32
    %c0_i32_0 = arith.constant 0 : i32
    %c0_i32_1 = arith.constant 0 : i32
    %c0_i32_2 = arith.constant 0 : i32
    return %c0_i32, %c0_i32_0, %c0_i32_1 : i32, i32, i32
  }
  func.func @transform_2(%arg0: i32) -> (i32, i32) {
    %c0_i32 = arith.constant 0 : i32
    %c0_i32_0 = arith.constant 0 : i32
    %c0_i32_1 = arith.constant 0 : i32
    return %c0_i32, %c0_i32_0 : i32, i32
  }
  func.func @transform_3(%arg0: i32) -> (i32, i32) {
    %c0_i32 = arith.constant 0 : i32
    %c0_i32_0 = arith.constant 0 : i32
    %c0_i32_1 = arith.constant 0 : i32
    return %c0_i32, %c0_i32_0 : i32, i32
  }
  func.func @transform_4(%arg0: i32) -> (i32, i32) {
    %c0_i32 = arith.constant 0 : i32
    %c0_i32_0 = arith.constant 0 : i32
    %c0_i32_1 = arith.constant 0 : i32
    return %c0_i32, %c0_i32_0 : i32, i32
  }
  func.func @transform_5(%arg0: i32) -> (i32, i32, i32) {
    %c0_i32 = arith.constant 0 : i32
    %c0_i32_0 = arith.constant 0 : i32
    %c0_i32_1 = arith.constant 0 : i32
    %c0_i32_2 = arith.constant 0 : i32
    return %c0_i32, %c0_i32_0, %c0_i32_1 : i32, i32, i32
  }
  func.func @transform_6(%arg0: i32) -> (i32, i32) {
    %c0_i32 = arith.constant 0 : i32
    %c0_i32_0 = arith.constant 0 : i32
    %c0_i32_1 = arith.constant 0 : i32
    return %c0_i32, %c0_i32_0 : i32, i32
  }
  func.func @transform_7(%arg0: i32) -> (i32, i32) {
    %c0_i32 = arith.constant 0 : i32
    %c0_i32_0 = arith.constant 0 : i32
    %c0_i32_1 = arith.constant 0 : i32
    return %c0_i32, %c0_i32_0 : i32, i32
  }
  func.func @transform_8(%arg0: i32) -> (i32, i32) {
    %c0_i32 = arith.constant 0 : i32
    %c0_i32_0 = arith.constant 0 : i32
    %c0_i32_1 = arith.constant 0 : i32
    return %c0_i32, %c0_i32_0 : i32, i32
  }
  func.func @transform_9(%arg0: i32) -> (i32, i32) {
    %c0_i32 = arith.constant 0 : i32
    %c0_i32_0 = arith.constant 0 : i32
    %c0_i32_1 = arith.constant 0 : i32
    return %c0_i32, %c0_i32_0 : i32, i32
  }
  func.func @transform_10(%arg0: i32) -> (i32, i32) {
    %c0_i32 = arith.constant 0 : i32
    %c0_i32_0 = arith.constant 0 : i32
    %c0_i32_1 = arith.constant 0 : i32
    return %c0_i32, %c0_i32_0 : i32, i32
  }
  func.func @transform_11(%arg0: i32) -> (i32, i32) {
    %c0_i32 = arith.constant 0 : i32
    %c0_i32_0 = arith.constant 0 : i32
    %c0_i32_1 = arith.constant 0 : i32
    return %c0_i32, %c0_i32_0 : i32, i32
  }
  func.func @transform_12(%arg0: i32) -> (i32, i32) {
    %c0_i32 = arith.constant 0 : i32
    %c0_i32_0 = arith.constant 0 : i32
    %c0_i32_1 = arith.constant 0 : i32
    return %c0_i32, %c0_i32_0 : i32, i32
  }
  func.func @transform_13(%arg0: i32) -> (i32, i32) {
    %c0_i32 = arith.constant 0 : i32
    %c0_i32_0 = arith.constant 0 : i32
    %c0_i32_1 = arith.constant 0 : i32
    return %c0_i32, %c0_i32_0 : i32, i32
  }
  func.func @transform_14(%arg0: i32) -> (i32, i32) {
    %c0_i32 = arith.constant 0 : i32
    %c0_i32_0 = arith.constant 0 : i32
    %c0_i32_1 = arith.constant 0 : i32
    return %c0_i32, %c0_i32_0 : i32, i32
  }
  func.func @transform_15(%arg0: i32) -> (i32, i32, i32) {
    %c0_i32 = arith.constant 0 : i32
    %c0_i32_0 = arith.constant 0 : i32
    %c0_i32_1 = arith.constant 0 : i32
    return %arg0, %c0_i32, %c0_i32_0 : i32, i32, i32
  }
}

</mosaic_0001>

<bundles_post_ra>
// kernel: net_forward.1
= control target key start
LH: loop header
LB: loop body
LE: loop exit
PB: predicated region body
PF: predicated region fallthrough
CT: control target
= control target key end

     0   :  { %20 = vsyncpa [#allocation6], 0  ;;  %s4557_s0 = inlined_call_operand.vmem [shape: f32[2,32,32], index: 0, kind: input, shape index: {}]   ;;  %s4558_s1 = inlined_call_operand.vmem [shape: bf16[5,32,168], index: 1, kind: input, shape index: {}]   ;;  %s4559_s2 = inlined_call_operand.vmem [shape: f32[1,168], index: 2, kind: input, shape index: {}]   ;;  %s4560_s3 = inlined_call_operand.vmem [shape: bf16[168,84], index: 3, kind: input, shape index: {}]   ;;  %s4561_s4 = inlined_call_operand.vmem [shape: bf16[14,28], index: 4, kind: input, shape index: {}]   ;;  %s4562_s5 = inlined_call_operand.vmem [shape: bf16[5,84,160], index: 5, kind: input, shape index: {}]   ;;  %s4563_s6 = inlined_call_operand.vmem [shape: f32[1,160], index: 6, kind: input, shape index: {}]   ;;  %s4564_s7 = inlined_call_operand.vmem [shape: bf16[160,128], index: 7, kind: input, shape index: {}]   ;;  %s4565_s8 = inlined_call_operand.vmem [shape: bf16[5,10], index: 8, kind: input, shape index: {}]   ;;  %s4566_s9 = inlined_call_operand.vmem [shape: bf16[640,120], index: 9, kind: input, shape index: {}]   ;;  %s4567_s10 = inlined_call_operand.vmem [shape: f32[1,120], index: 10, kind: input, shape index: {}]   ;;  %s4568_s11 = inlined_call_operand.vmem [shape: bf16[120,84], index: 11, kind: input, shape index: {}]   ;;  %s4569_s12 = inlined_call_operand.vmem [shape: f32[1,84], index: 12, kind: input, shape index: {}]   ;;  %s4570_s13 = inlined_call_operand.vmem [shape: bf16[84,128], index: 13, kind: input, shape index: {}]   ;;  %s4571_s14 = inlined_call_operand.vmem [shape: f32[1,128], index: 14, kind: input, shape index: {}]   ;;  %s4572_s15 = inlined_call_operand.hbm [shape: f32[2,1,128], index: 15, kind: output, shape index: {}]  }
   0x1   :  { %22 = vsyncpa [#allocation6 + $0x1], 0  ;;  %s3797_s18 = smov 0   ;;  %s3799_s19 = smov 0  }
   0x2   :  { %s3801_s20 = smov 0   ;;  %s3803_s21 = smov 0  }
   0x3 LB: > { %4578 = sst [smem:[#allocation8_spill]] %s3695_s18  ;;  %s3818_s22 = sadd.s32 4294967295, %s3707_s21   ;;  %s3707_s21 = sphi %s3803_s21, %s4587_s21   ;;  %s3703_s20 = sphi %s3801_s20, %s4589_s20   ;;  %s3699_s19 = sphi %s3799_s19, %s4591_s19   ;;  %s3695_s18 = sphi %s3797_s18, %s4590_s18  }
   0x4   : > { %4579 = sst [smem:[#allocation9_spill]] %s3703_s20  ;;  %s2906_s23 = sadd.s32 4294967294, %s3707_s21  }
   0x5   : > { %s3822_s24 = sadd.s32 1, %s3707_s21   ;;  %s355_s25 = sadd.s32 1, %s3703_s20 }
   0x6   : > { %4580 = sst [smem:[#allocation10_spill]] %s3822_s24  ;;  %s352_s26 = ssub.s32 %s3707_s21, %s3822_s24 }
   0x7   : > { %p365_p0 = scmp.ne.s32.totalorder %s3703_s20, %s3699_s19  ;;  %p353_p1 = scmp.eq.s32.totalorder %s352_s26, 0 }
   0x8   : > { %p366_p2 = scmp.eq.s32.totalorder %s3818_s22, 1  ;;  %p371_p3 = scmp.ne.s32.totalorder %s3699_s19, %s3695_s18 }
   0x9   : > { %p372_p4 = scmp.eq.s32.totalorder %s2906_s23, 1  ;;  %p2909_p7 = scmp.ge.s32.totalorder %s3707_s21, 1 }
   0xa   : > { %s3833_s27 = scalar_select %p353_p1, %s3703_s20, %s355_s25  }
   0xb   : > { %p3835_p5 = por %p366_p2, %p365_p0  ;;  %p3839_p6 = por %p372_p4, %p371_p3 }
   0xc   : > { %4581 = sst [smem:[#allocation11_spill]] %s3833_s27  ;;  %p440_p8 = scmp.lt.s32.totalorder %s3707_s21, 3 }
   0xd   : > { %s4583_s29 = scalar_select %p3839_p6, 1, 0 }
   0xe   : > { %p441_p9 = pnand %p2909_p7, %p440_p8 }
   0xf   : > { %4584 = sst [smem:[#allocation12_spill]] %s4583_s29  ;;  %v3454_v0 = vld [vmem:[%s4558_s1 + $0x24] ss:$8 sps:$4 sm:$0xff] (!%p441_p9)   ;;  %p487_p10 = scmp.lt.s32.totalorder (!%p441_p9), %s3818_s22, 1  ;;  %v3456_v1 = vld [vmem:[%s4558_s1 + $0x20] ss:$8 sps:$4 sm:$0xff] (!%p441_p9)   ;;  %v505_v59 = vlaneseq (!%p441_p9) }
  0x10   : > { %444 = sbr.rel (%p441_p9) target bundleno = 2722 (0xaa2), region = 80  ;;  %v3709_v2 = vmov (!%p441_p9), 0   ;;  %632 = vmatprep.subr.bf16.mxu0 (!%p441_p9), %v3454_v0  ;;  %v3457_v3 = vld [vmem:[%s4558_s1 + $0x34] ss:$8 sps:$4 sm:$0xff] (!%p441_p9)   ;;  %v3459_v4 = vld [vmem:[%s4558_s1 + $0x30] ss:$8 sps:$4 sm:$0xff] (!%p441_p9)  }
  0x11   : > { %664 = vmatprep.mubr.bf16.mxu0 (!%p441_p9), %v3709_v2  ;;  %574 = vmatprep.mubr.bf16.mxu1 (!%p441_p9), %v3709_v2  ;;  %v3462_v5 = vld [vmem:[%s4558_s1 + $0x44] ss:$8 sps:$4 sm:$0xff] (!%p441_p9)   ;;  %vm535_vm0 = vcmask (!%p441_p9), 261120   ;;  %v3460_v9 = vld [vmem:[%s4558_s1 + $0x40] ss:$8 sps:$4 sm:$0xff] (!%p441_p9)   ;;  %v3954_v60 = vshrl.u32 (!%p441_p9), %v505_v59, 7 }
  0x12   : > { %633 = vmatpush1.bf16.msra.mxu0 (!%p441_p9), %v3456_v1  ;;  %v3465_v10 = vld [vmem:[%s4558_s1 + $0x54] ss:$8 sps:$4 sm:$0xff] (!%p441_p9)   ;;  %v3463_v13 = vld [vmem:[%s4558_s1 + $0x50] ss:$8 sps:$4 sm:$0xff] (!%p441_p9)   ;;  %v3468_v14 = vld [vmem:[%s4558_s1 + $0x64] ss:$8 sps:$4 sm:$0xff] (!%p441_p9)  }
  0x13   : > { %634 = vmatprep.subr.bf16.mxu0 (!%p441_p9), %v3457_v3  ;;  %v3472_v15 = vld [vmem:[%s4558_s1 + $0x4] ss:$8 sps:$4 sm:$0xff] (!%p441_p9)   ;;  %v3474_v16 = vld [vmem:[%s4558_s1] ss:$8 sps:$4 sm:$0xff] (!%p441_p9)   ;;  %v3475_v17 = vld [vmem:[%s4558_s1 + $0x14] ss:$8 sps:$4 sm:$0xff] (!%p441_p9)  }
  0x14   : > { %542 = vmatprep.subr.bf16.mxu1 (!%p441_p9), %v3472_v15  ;;  %v3477_v19 = vld [vmem:[%s4558_s1 + $0x10] ss:$8 sps:$4 sm:$0xff] (!%p441_p9)   ;;  %v3466_v25 = vld [vmem:[%s4558_s1 + $0x60] ss:$8 sps:$4 sm:$0xff] (!%p441_p9)   ;;  %v3471_v29 = vld [vmem:[%s4558_s1 + $0x74] ss:$8 sps:$4 sm:$0xff] (!%p441_p9)  }
  0x15   : > { %543 = vmatpush1.bf16.msra.mxu1 (!%p441_p9), %v3474_v16  ;;  %v3469_v32 = vld [vmem:[%s4558_s1 + $0x70] ss:$8 sps:$4 sm:$0xff] (!%p441_p9)   ;;  %v3480_v33 = vld [vmem:[%s4558_s1 + $0x84] ss:$8 sps:$4 sm:$0xff] (!%p441_p9)   ;;  %v3478_v38 = vld [vmem:[%s4558_s1 + $0x80] ss:$8 sps:$4 sm:$0xff] (!%p441_p9)  }
  0x16   : > { %635 = vmatpush1.bf16.msra.mxu0 (!%p441_p9), %v3459_v4  ;;  %544 = vmatprep.subr.bf16.mxu1 (!%p441_p9), %v3475_v17  ;;  %v3483_v40 = vld [vmem:[%s4558_s1 + $0x94] ss:$8 sps:$4 sm:$0xff] (!%p441_p9)   ;;  %v3481_v43 = vld [vmem:[%s4558_s1 + $0x90] ss:$8 sps:$4 sm:$0xff] (!%p441_p9)   ;;  %v3957_v61 = vsub.s32 (!%p441_p9), 0, %v3954_v60  ;;  %v3963_v63 = vsub.s32 (!%p441_p9), 1, %v3954_v60 }
  0x17   : > { %s488_s27 = scalar_select %p487_p10, %s3818_s22, 1  ;;  %730 = vmatprep.subr.bf16.mxu0 %v3462_v5  ;;  %v503_v62 = vld [vmem:[%s4559_s2] sm:$0x3]  ;;  %vm995_vm1 = vcmask 1047872   ;;  %vm1148_vm2 = vcmask 1043456   ;;  %vm1032_vm3 = vcmask 998400  }
  0x18   : > { %v508_v0 = vrot.slane %v503_v62, %v3957_v61  ;;  %v512_v1 = vrot.slane %v503_v62, %v3963_v63  ;;  %s3711_s30 = smov 122   ;;  %vm1141_vm4 = vcmask 326656   ;;  %vm3713_vm5 = vmmov 0   ;;  %s3715_s29 = smov 112  }
  0x19   : > { %s3158_s20 = sshll.u32 %s488_s27, 5  ;;  %545 = vmatpush1.bf16.msra.mxu1 %v3477_v19  ;;  %s3710_s27 = smov 40   ;;  %vm1208_vm6 = vcmask 1046528   ;;  %vm1201_vm7 = vcmask 1047556   ;;  %vm1237_vm8 = vcmask 1045504   ;;  %vm1233_vm9 = vcmask 228352  }
  0x1a   : > { %s3867_s18 = scalar_lea.vmem %s4557_s0, %s3158_s20  ;;  %1152 = vmatprep.subr.bf16.mxu1 %v3709_v2  ;;  %vm1370_vm10 = vcmask 1041408   ;;  %vm1282_vm11 = vcmask 687104   ;;  %vm1284_vm12 = vcmask 685056   ;;  %vm1928_vm13 = vcmask 1047808   ;;  %s485_s25 = sand.u32 1, %s3699_s19  }
  0x1b   : > { %v595_v6 = vld [vmem:[%s3867_s18 + $0x1] sm:$0xff]  ;;  %v596_v7 = vld [vmem:[%s3867_s18 + $0x9] sm:$0xff]  ;;  %v597_v11 = vld [vmem:[%s3867_s18 + $0x11] sm:$0xff]  ;;  %vm1947_vm14 = vcmask 916480   ;;  %vm2084_vm15 = vcmask 1047554   ;;  %s486_s20 = scalar_lea.vmem [#allocation5], %s485_s25 }
  0x1c   : > { %v599_v8 = vpack.c.bf16 %v596_v7, %v595_v6  ;;  %v598_v12 = vld [vmem:[%s3867_s18 + $0x19] sm:$0xf]  ;;  %v493_v20 = vld [vmem:[%s3867_s18] sm:$0xff]  ;;  %v494_v21 = vld [vmem:[%s3867_s18 + $0x8] sm:$0xff]  ;;  %s2851_s24 = sshll.u32 %s486_s20, 4  ;;  %s2839_s23 = scalar_lea.sflag [#allocation6], %s485_s25  ;;  %s4517_s24 = int_to_ptr.vmem [resolvable:$true] %s2851_s24 }
  0x1d   : > { %v600_v18 = vpack.c.bf16 %v598_v12, %v597_v11  ;;  %v497_v22 = vpack.c.bf16 %v494_v21, %v493_v20  ;;  %v693_v23 = vld [vmem:[%s3867_s18 + $0x2] sm:$0xff]  ;;  %v694_v24 = vld [vmem:[%s3867_s18 + $0xa] sm:$0xff]  ;;  %v496_v27 = vld [vmem:[%s3867_s18 + $0x18] sm:$0xf] }
  0x1e   : > { %2926 = vmatmul.mubr.msk.bf16.vlgmr.msra.gmra.mrb[0].mxu0 %vm535_vm0, %v599_v8  ;;  %v495_v26 = vld [vmem:[%s3867_s18 + $0x10] sm:$0xff]  ;;  %v697_v28 = vpack.c.bf16 %v694_v24, %v693_v23  ;;  %v696_v31 = vld [vmem:[%s3867_s18 + $0x1a] sm:$0xf]  ;;  %v791_v36 = vld [vmem:[%s3867_s18 + $0x3] sm:$0xff] }
  0x1f   : > { %674 = vmatprep.mubr.bf16.mxu0 %v3709_v2  ;;  %731 = vmatpush1.bf16.msra.mxu0 %v3460_v9  ;;  %v695_v30 = vld [vmem:[%s3867_s18 + $0x12] sm:$0xff]  ;;  %v498_v34 = vpack.c.bf16 %v496_v27, %v495_v26  ;;  %v794_v42 = vld [vmem:[%s3867_s18 + $0x1b] sm:$0xf]  ;;  %v889_v45 = vld [vmem:[%s3867_s18 + $0x4] sm:$0xff] }
  0x20   : > { %732 = vmatprep.subr.bf16.mxu0 %v3465_v10  ;;  %2916 = vmatmul.mubr.msk.bf16.vlgmr.msra.gmra.mrb[0].mxu1 %vm535_vm0, %v497_v22  ;;  %v698_v35 = vpack.c.bf16 %v696_v31, %v695_v30  ;;  %v792_v37 = vld [vmem:[%s3867_s18 + $0xb] sm:$0xff]  ;;  %v793_v41 = vld [vmem:[%s3867_s18 + $0x13] sm:$0xff]  ;;  %v892_v49 = vld [vmem:[%s3867_s18 + $0x1c] sm:$0xf] }
  0x21   : > { %584 = vmatprep.mubr.bf16.mxu1 %v3709_v2  ;;  %v795_v39 = vpack.c.bf16 %v792_v37, %v791_v36  ;;  %v796_v44 = vpack.c.bf16 %v794_v42, %v793_v41  ;;  %v890_v46 = vld [vmem:[%s3867_s18 + $0xc] sm:$0xff]  ;;  %v891_v48 = vld [vmem:[%s3867_s18 + $0x14] sm:$0xff]  ;;  %v3488_v37 = vld [vmem:[%s4560_s3 + $0x20] sm:$0xff]   ;;  %s3716_s18 = smov [#allocation5]  }
  0x22   : > { %v893_v47 = vpack.c.bf16 %v890_v46, %v889_v45  ;;  %v894_v50 = vpack.c.bf16 %v892_v49, %v891_v48  ;;  %v3485_v30 = vld [vmem:[%s4560_s3 + $0x8] sm:$0xff]   ;;  %v3487_v36 = vld [vmem:[%s4560_s3 + $0x18] sm:$0xff]   ;;  %v3492_v41 = vld [vmem:[%s4560_s3 + $0x40] sm:$0xff]   ;;  %s3649_s26 = sshll.u32 %s3716_s18, 4  ;;  %s3650_s26 = int_to_ptr.vmem [resolvable:$false] %s3649_s26 }
  0x23   : > { %733 = vmatpush1.bf16.msra.mxu0 %v3463_v13  ;;  %v3493_v42 = vld [vmem:[%s4560_s3 + $0x48] sm:$0xff]   ;;  %p3652_p0 = scmp.lt.s32.totalorder %s4517_s24, %s3650_s26 }
  0x24   : > { %828 = vmatprep.subr.bf16.mxu0 %v3468_v14 }
  0x26   : > { %2927 = vmatmul.mubr.msk.bf16.gmra.mrb[4].mxu0 %vm535_vm0, %v600_v18 }
  0x27   : > { %762 = vmatprep.mubr.bf16.mxu0 %v3709_v2 }
  0x28   : > { %2917 = vmatmul.mubr.msk.bf16.gmra.mrb[4].mxu1 %vm535_vm0, %v498_v34 }
  0x2e   : > { %2936 = vmatmul.mubr.msk.bf16.vlgmr.msra.gmra.mrb[0].mxu0 %vm535_vm0, %v697_v28 }
  0x2f   : > { %772 = vmatprep.mubr.bf16.mxu0 %v3709_v2  ;;  %829 = vmatpush1.bf16.msra.mxu0 %v3466_v25  ;;  %v3484_v25 = vld [vmem:[%s4560_s3] sm:$0xff]  }
  0x30   : > { %830 = vmatprep.subr.bf16.mxu0 %v3471_v29  ;;  %1153 = vmatpush1.bf16.msra.mxu1 %v3484_v25 }
  0x31   : > { %1154 = vmatprep.subr.bf16.mxu1 %v3709_v2 }
  0x33   : > { %831 = vmatpush1.bf16.msra.mxu0 %v3469_v32 }
  0x34   : > { %926 = vmatprep.subr.bf16.mxu0 %v3480_v33  ;;  %1155 = vmatpush1.bf16.msra.mxu1 %v3485_v30 }
  0x35   : > { %1156 = vmatprep.subr.bf16.mxu1 %v3709_v2 }
  0x36   : > { %2937 = vmatmul.mubr.msk.bf16.gmra.mrb[4].mxu0 %vm535_vm0, %v698_v35  ;;  %v3486_v35 = vld [vmem:[%s4560_s3 + $0x10] sm:$0xff]  }
  0x37   : > { %860 = vmatprep.mubr.bf16.mxu0 %v3709_v2 }
  0x38   : > { %1157 = vmatpush1.bf16.msra.mxu1 %v3486_v35  ;;  %v3496_v35 = vld [vmem:[%s4562_s5] ss:$8 sps:$4 sm:$0xff]  }
  0x39   : > { %1158 = vmatprep.subr.bf16.mxu1 %v3709_v2 }
  0x3c   : > { %1159 = vmatpush1.bf16.msra.mxu1 %v3487_v36  ;;  %v3499_v36 = vld [vmem:[%s4562_s5 + $0x10] ss:$8 sps:$4 sm:$0xff]  }
  0x3d   : > { %1160 = vmatprep.subr.bf16.mxu1 %v3709_v2 }
  0x3e   : > { %2946 = vmatmul.mubr.msk.bf16.vlgmr.msra.gmra.mrb[0].mxu0 %vm535_vm0, %v795_v39  ;;  %v3490_v39 = vld [vmem:[%s4560_s3 + $0x30] sm:$0xff]  }
  0x3f   : > { %870 = vmatprep.mubr.bf16.mxu0 %v3709_v2  ;;  %927 = vmatpush1.bf16.msra.mxu0 %v3478_v38  ;;  %v3489_v38 = vld [vmem:[%s4560_s3 + $0x28] sm:$0xff]  }
  0x40   : > { %928 = vmatprep.subr.bf16.mxu0 %v3483_v40  ;;  %1161 = vmatpush1.bf16.msra.mxu1 %v3488_v37  ;;  %v3491_v40 = vld [vmem:[%s4560_s3 + $0x38] sm:$0xff]   ;;  %v3504_v37 = vld [vmem:[%s4562_s5 + $0x24] ss:$8 sps:$4 sm:$0xff]  }
  0x41   : > { %1162 = vmatprep.subr.bf16.mxu1 %v3709_v2 }
  0x43   : > { %929 = vmatpush1.bf16.msra.mxu0 %v3481_v43  ;;  %v3494_v43 = vld [vmem:[%s4560_s3 + $0x50] ss:$0 sps:$4 sm:$0xff]  }
  0x44   : > { %1163 = vmatpush1.bf16.msra.mxu1 %v3489_v38  ;;  %v1150_v48 = vsel %vm1148_vm2, %v3494_v43, 0  ;;  %v3502_v38 = vld [vmem:[%s4562_s5 + $0x20] ss:$8 sps:$4 sm:$0xff]  }
  0x45   : > { %1164 = vmatprep.subr.bf16.mxu1 %v3709_v2 }
  0x46   : > { %2947 = vmatmul.mubr.msk.bf16.gmra.mrb[4].mxu0 %vm535_vm0, %v796_v44 }
  0x47   : > { %958 = vmatprep.mubr.bf16.mxu0 %v3709_v2 }
  0x48   : > { %1165 = vmatpush1.bf16.msra.mxu1 %v3490_v39 }
  0x49   : > { %1166 = vmatprep.subr.bf16.mxu1 %v3709_v2 }
  0x4c   : > { %1167 = vmatpush1.bf16.msra.mxu1 %v3491_v40 }
  0x4d   : > { %1168 = vmatprep.subr.bf16.mxu1 %v3709_v2 }
  0x4e   : > { %2956 = vmatmul.mubr.msk.bf16.vlgmr.msra.gmra.mrb[0].mxu0 %vm535_vm0, %v893_v47 }
  0x4f   : > { %968 = vmatprep.mubr.bf16.mxu0 %v3709_v2 }
  0x50   : > { %1169 = vmatpush1.bf16.msra.mxu1 %v3492_v41 }
  0x51   : > { %1170 = vmatprep.subr.bf16.mxu1 %v3709_v2 }
  0x54   : > { %1171 = vmatpush1.bf16.msra.mxu1 %v3493_v42 }
  0x55   : > { %1172 = vmatprep.subr.bf16.mxu1 %v3709_v2 }
  0x56   : > { %2957 = vmatmul.mubr.msk.bf16.gmra.mrb[4].mxu0 %vm535_vm0, %v894_v50 }
  0x58   : > { %1173 = vmatpush1.bf16.msra.mxu1 %v1150_v48 }
  0xf3   : > { %v576_v51 = vpop.f32.mrb[0].mxu1 }
  0xf4   : > { %v578_v52 = vpop.f32.mrb[1].mxu1  ;;  %v577_v3 = vadd.f32 %v576_v51, %v508_v0 }
  0xf5   : > { %v580_v53 = vpop.f32.mrb[2].mxu1  ;;  %v579_v4 = vadd.f32 %v578_v52, %v512_v1 }
  0xf6   : > { %v582_v54 = vpop.f32.mrb[3].mxu1  ;;  %v581_v6 = vadd.f32 %v580_v53, %v508_v0 }
  0xf7   : > { %v583_v9 = vadd.f32 %v582_v54, %v512_v1 }
  0xfb   : > { %v586_v55 = vpop.f32.mrb[4].mxu1 }
  0xfc   : > { %v588_v56 = vpop.f32.mrb[5].mxu1  ;;  %v587_v17 = vadd.f32 %v586_v55, %v508_v0 }
  0xfd   : > { %v590_v57 = vpop.f32.mrb[6].mxu1  ;;  %v589_v18 = vadd.f32 %v588_v56, %v512_v1 }
  0xfe   : > { %v592_v58 = vpop.f32.mrb[7].mxu1  ;;  %v591_v19 = vadd.f32 %v590_v57, %v508_v0 }
  0xff   : > { %v593_v22 = vadd.f32 %v592_v58, %v512_v1 }
 0x121   : > { %v960_v5 = vpop.f32.mrb[0].mxu0 }
 0x122   : > { %v3304_v7 = vadd.f32 %v960_v5, %v577_v3  ;;  %v962_v8 = vpop.f32.mrb[1].mxu0 }
 0x123   : > { %v3967_v10 = vadd.f32 %v962_v8, %v579_v4  ;;  %v964_v11 = vpop.f32.mrb[2].mxu0 }
 0x124   : > { %v3308_v12 = vadd.f32 %v964_v11, %v581_v6  ;;  %v966_v13 = vpop.f32.mrb[3].mxu0  ;;  %v3971_v15 = vmax.f32 %v3304_v7, 0.0 }
 0x125   : > { %v3969_v14 = vadd.f32 %v966_v13, %v583_v9  ;;  %v988_v45 = vmax.f32 %v3967_v10, 0.0 }
 0x126   : > { %v3973_v16 = vmax.f32 %v3308_v12, 0.0 }
 0x127   : > { %v990_v49 = vmax.f32 %v3969_v14, 0.0 }
 0x128   : > { %v3409_v20 = vpack.i.bf16 %v3973_v16, %v3971_v15 }
 0x129   : > { %v970_v21 = vpop.f32.mrb[4].mxu0 }
 0x12a   : > { %v3312_v23 = vadd.f32 %v970_v21, %v587_v17  ;;  %v972_v24 = vpop.f32.mrb[5].mxu0  ;;  %3410 = vrot.lane.b32.xlu0 %v3409_v20, %s3710_s27 }
 0x12b   : > { %v3980_v26 = vadd.f32 %v972_v24, %v589_v18  ;;  %v974_v27 = vpop.f32.mrb[6].mxu0 }
 0x12c   : > { %v3316_v28 = vadd.f32 %v974_v27, %v591_v19  ;;  %v976_v29 = vpop.f32.mrb[7].mxu0  ;;  %v3988_v32 = vmax.f32 %v3312_v23, 0.0 }
 0x12d   : > { %v3985_v31 = vadd.f32 %v976_v29, %v593_v22  ;;  %v992_v55 = vmax.f32 %v3980_v26, 0.0 }
 0x12e   : > { %v3990_v33 = vmax.f32 %v3316_v28, 0.0 }
 0x12f   : > { %v994_v56 = vmax.f32 %v3985_v31, 0.0 }
 0x130   : > { %v3414_v34 = vpack.i.bf16 %v3990_v33, %v3988_v32 }
 0x132   : > { %3415 = vrot.lane.b32.xlu0 %v3414_v34, %s3710_s27  ;;  %v3712_v34 = vmov 0.0   ;;  %s3155_s27 = sshll.u32 %s3818_s22, 4  ;;  %s3645_s22 = scalar_lea.vmem %s4517_s24, 16 }
 0x133   : > { %3233 = vmatprep.subr.bf16.mxu0 %v3712_v34  ;;  %3237 = vmatprep.mubr.msk.bf16.mxu0 %vm3713_vm5, %v3712_v34  ;;  %s4515_s17 = scalar_lea.hbm %s4572_s15, %s3155_s27  ;;  %p3646_p11 = scmp.ne.s32.totalorder %s4517_s24, %s3645_s22 }
 0x135   : > { %p3647_p12 = pnand %p3646_p11, %p3835_p5 }
 0x137   : > { %p3648_p13 = pneg %p3647_p12 }
 0x19c   : > { %v3411_v44 = vpop.permute.xlu0 %3410 }
 0x19d   : > { %v3413_v46 = vunpack.i.h.bf16 %v3411_v44  ;;  %v3412_v47 = vunpack.i.l.bf16 %v3411_v44 }
 0x19f   : > { %v1004_v50 = vsel %vm995_vm1, %v3412_v47, %v988_v45  ;;  %v1005_v52 = vsel %vm995_vm1, %v3413_v46, %v990_v49 }
 0x1a0   : > { %v3419_v51 = vpack.i.bf16 %v1004_v50, %v3971_v15  ;;  %v3424_v54 = vpack.i.bf16 %v1005_v52, %v3973_v16 }
 0x1a2   : > { %3420 = vrot.lane.b32.xlu1 %v3419_v51, %s3711_s30 }
 0x1a4   : > { %v3416_v53 = vpop.permute.xlu0 %3415 }
 0x1a5   : > { %v3418_v57 = vunpack.i.h.bf16 %v3416_v53  ;;  %v3417_v58 = vunpack.i.l.bf16 %v3416_v53 }
 0x1a6   : > { %3425 = vrot.lane.b32.xlu1 %v3424_v54, %s3711_s30 }
 0x1a7   : > { %v1006_v62 = vsel %vm995_vm1, %v3417_v58, %v992_v55  ;;  %v1007_v0 = vsel %vm995_vm1, %v3418_v57, %v994_v56  ;;  %vm2098_vm1 = vcmask 80896  }
 0x1a8   : > { %v3429_v1 = vpack.i.bf16 %v1006_v62, %v3988_v32  ;;  %v3434_v3 = vpack.i.bf16 %v1007_v0, %v3990_v33 }
 0x1aa   : > { %3430 = vrot.lane.b32.xlu0 %v3429_v1, %s3711_s30  ;;  %3435 = vrot.lane.b32.xlu1 %v3434_v3, %s3711_s30  ;;  %s3714_s30 = smov 32  }
 0x214   : > { %v3421_v4 = vpop.permute.xlu1 %3420 }
 0x215   : > { %v3423_v5 = vunpack.i.h.bf16 %v3421_v4  ;;  %v3422_v6 = vunpack.i.l.bf16 %v3421_v4  ;;  %v3495_v4 = vld [vmem:[%s4561_s4] sm:$0x7f]  }
 0x217   : > { %v1033_v8 = vsel %vm1032_vm3, %v3422_v6, %v3423_v5  ;;  %v1046_v11 = vmax.f32 %v988_v45, %v3423_v5  ;;  %v3507_v5 = vld [vmem:[%s4562_s5 + $0x34] ss:$8 sps:$4 sm:$0xff]   ;;  %v3505_v6 = vld [vmem:[%s4562_s5 + $0x30] ss:$8 sps:$4 sm:$0xff]  }
 0x218   : > { %v3426_v7 = vpop.permute.xlu1 %3425  ;;  %v1045_v14 = vmax.f32 %v3971_v15, %v1033_v8  ;;  %v3510_v8 = vld [vmem:[%s4562_s5 + $0x44] ss:$8 sps:$4 sm:$0xff]  }
 0x219   : > { %v3428_v9 = vunpack.i.h.bf16 %v3426_v7  ;;  %v3427_v10 = vunpack.i.l.bf16 %v3426_v7  ;;  %v3508_v7 = vld [vmem:[%s4562_s5 + $0x40] ss:$8 sps:$4 sm:$0xff]  }
 0x21b   : > { %v1048_v12 = vmax.f32 %v990_v49, %v3428_v9  ;;  %v1034_v13 = vsel %vm1032_vm3, %v3427_v10, %v3428_v9  ;;  %v1299_v9 = vld [vmem:[%s4562_s5 + $0x50] sm:$0x33] }
 0x21c   : > { %v1047_v17 = vmax.f32 %v3973_v16, %v1034_v13  ;;  %v3431_v18 = vpop.permute.xlu0 %3430  ;;  %v3436_v19 = vpop.permute.xlu1 %3435  ;;  %v2984_v10 = vcombine.high %v1299_v9, %v1299_v9  ;;  %v3515_v13 = vld [vmem:[%s4562_s5 + $0x5c] ss:$8 sps:$4 sm:$0xff]  }
 0x21d   : > { %v1054_v20 = vpack.c.bf16 %v1048_v12, %v1046_v11  ;;  %v3433_v21 = vunpack.i.h.bf16 %v3431_v18  ;;  %v3432_v22 = vunpack.i.l.bf16 %v3431_v18  ;;  %v3438_v23 = vunpack.i.h.bf16 %v3436_v19 }
 0x21e   : > { %v1053_v24 = vpack.c.bf16 %v1047_v17, %v1045_v14  ;;  %v3437_v25 = vunpack.i.l.bf16 %v3436_v19  ;;  %v2983_v11 = vcombine.low %v1299_v9, %v1299_v9 }
 0x21f   : > { %v1050_v26 = vmax.f32 %v992_v55, %v3433_v21  ;;  %v1035_v27 = vsel %vm1032_vm3, %v3432_v22, %v3433_v21  ;;  %v1052_v28 = vmax.f32 %v994_v56, %v3438_v23  ;;  %2969 = vmatprep.mubr.msk.bf16.mxu1 %vm1141_vm4, %v1054_v20  ;;  %v3513_v20 = vld [vmem:[%s4562_s5 + $0x58] ss:$8 sps:$4 sm:$0xff]  }
 0x220   : > { %v1036_v29 = vsel %vm1032_vm3, %v3437_v25, %v3438_v23  ;;  %1185 = vmatmul.mubr.bf16.vlgmr.msra.gmra.mrb[8].mxu1 %v1053_v24  ;;  %v1049_v16 = vmax.f32 %v3988_v32, %v1035_v27  ;;  %v3498_v32 = vld [vmem:[%s4562_s5 + $0x4] ss:$8 sps:$4 sm:$0xff]   ;;  %v1372_v12 = vsel %vm1370_vm10, %v2983_v11, 0  ;;  %v3516_v25 = vld [vmem:[%s4562_s5 + $0x68] ss:$8 sps:$4 sm:$0xff]   ;;  %vm2150_vm3 = vcmp.lt.s32.totalorder %v505_v59, 128 }
 0x221   : > { %v1056_v15 = vpack.c.bf16 %v1052_v28, %v1050_v26  ;;  %v1051_v30 = vmax.f32 %v3990_v33, %v1036_v29  ;;  %v3501_v33 = vld [vmem:[%s4562_s5 + $0x14] ss:$8 sps:$4 sm:$0xff]   ;;  %1377 = vmatprep.subr.bf16.mxu1 %v3498_v32  ;;  %v3519_v27 = vld [vmem:[%s4562_s5 + $0x78] ss:$8 sps:$4 sm:$0xff]   ;;  %v3522_v29 = vld [vmem:[%s4562_s5 + $0x88] ss:$8 sps:$4 sm:$0xff]  }
 0x222   : > { %1378 = vmatpush1.bf16.msra.mxu1 %v3496_v35  ;;  %v3518_v24 = vld [vmem:[%s4562_s5 + $0x6c] ss:$8 sps:$4 sm:$0xff]   ;;  %v3521_v26 = vld [vmem:[%s4562_s5 + $0x7c] ss:$8 sps:$4 sm:$0xff]  }
 0x223   : > { %2970 = vmatprep.mubr.msk.bf16.mxu1 %vm1141_vm4, %v1056_v15  ;;  %v1055_v31 = vpack.c.bf16 %v1051_v30, %v1049_v16  ;;  %1379 = vmatprep.subr.bf16.mxu1 %v3501_v33  ;;  %v3524_v28 = vld [vmem:[%s4562_s5 + $0x8c] ss:$8 sps:$4 sm:$0xff]   ;;  %v3527_v15 = vld [vmem:[%s4562_s5 + $0x9c] ss:$8 sps:$4 sm:$0xff]   ;;  %v3525_v30 = vld [vmem:[%s4562_s5 + $0x98] ss:$8 sps:$4 sm:$0xff]  }
 0x224   : > { %v2997_v16 = vld [vmem:[%s4562_s5 + $0xa8] sm:$0x33]  ;;  %v3532_v33 = vld [vmem:[%s4562_s5 + $0xb4] ss:$8 sps:$4 sm:$0xff]  }
 0x225   : > { %v3008_v35 = vcombine.low %v2997_v16, %v2997_v16 }
 0x226   : > { %1380 = vmatpush1.bf16.msra.mxu1 %v3499_v36 }
 0x227   : > { %1381 = vmatprep.subr.bf16.mxu1 %v3504_v37  ;;  %v1494_v32 = vsel %vm1370_vm10, %v3008_v35, 0 }
 0x228   : > { %1193 = vmatmul.mubr.bf16.gmra.mrb[12].mxu1 %v1055_v31  ;;  %v3009_v31 = vcombine.high %v2997_v16, %v2997_v16 }
 0x229   : > { %1409 = vmatprep.mubr.bf16.mxu1 %v3709_v2 }
 0x22a   : > { %1382 = vmatpush1.bf16.msra.mxu1 %v3502_v38  ;;  %v3530_v38 = vld [vmem:[%s4562_s5 + $0xb0] ss:$8 sps:$4 sm:$0xff]  }
 0x22b   : > { %1383 = vmatprep.subr.bf16.mxu1 %v3507_v5  ;;  %v3047_v5 = vld [vmem:[%s4562_s5 + $0x158] sm:$0x33] }
 0x22e   : > { %1384 = vmatpush1.bf16.msra.mxu1 %v3505_v6  ;;  %v3559_v6 = vld [vmem:[%s4562_s5 + $0x148] ss:$8 sps:$4 sm:$0xff]  }
 0x22f   : > { %1385 = vmatprep.subr.bf16.mxu1 %v3510_v8  ;;  %v3058_v8 = vcombine.low %v3047_v5, %v3047_v5 }
 0x231   : > { %v1746_v9 = vsel %vm1370_vm10, %v3058_v8, 0 }
 0x232   : > { %1386 = vmatpush1.bf16.msra.mxu1 %v3508_v7  ;;  %v3059_v7 = vcombine.high %v3047_v5, %v3047_v5 }
 0x233   : > { %2985 = vmatprep.subr.msk.bf16.mxu1 %vm1370_vm10, %v2984_v10  ;;  %v3566_v10 = vld [vmem:[%s4562_s5 + $0x164] ss:$8 sps:$4 sm:$0xff]  }
 0x236   : > { %1388 = vmatpush1.bf16.msra.mxu1 %v1372_v12 }
 0x237   : > { %1499 = vmatprep.subr.bf16.mxu1 %v3515_v13  ;;  %v3564_v13 = vld [vmem:[%s4562_s5 + $0x160] ss:$8 sps:$4 sm:$0xff]  }
 0x2f3   : > { %v1186_v39 = vpop.f32.mrb[8].mxu1 }
 0x2f4   : > { %v1188_v40 = vpop.f32.mrb[9].mxu1  ;;  %v1209_v42 = vrot.slane %v1186_v39, 1  ;;  %v1202_v48 = vrot.slane %v1186_v39, 4 }
 0x2f5   : > { %v1189_v41 = vpop.f32.mrb[10].mxu1  ;;  %v3535_v40 = vld [vmem:[%s4562_s5 + $0xc4] ss:$8 sps:$4 sm:$0xff]  }
 0x2f6   : > { %v1210_v43 = vrot.slane %v1189_v41, 1  ;;  %v1191_v44 = vpop.f32.mrb[11].mxu1 }
 0x2f7   : > { %v3541_v44 = vld [vmem:[%s4562_s5 + $0xe4] ss:$8 sps:$4 sm:$0xff]  }
 0x2f8   : > { %v1211_v45 = vsel %vm1208_vm6, %v1209_v42, %v1210_v43  ;;  %v3538_v42 = vld [vmem:[%s4562_s5 + $0xd4] ss:$8 sps:$4 sm:$0xff]  }
 0x2f9   : > { %v1220_v46 = vmax.f32 %v1186_v39, %v1211_v45  ;;  %v3539_v45 = vld [vmem:[%s4562_s5 + $0xe0] ss:$8 sps:$4 sm:$0xff]  }
 0x2fb   : > { %v1194_v47 = vpop.f32.mrb[12].mxu1 }
 0x2fc   : > { %v1212_v49 = vrot.slane %v1194_v47, 1  ;;  %v1196_v50 = vpop.f32.mrb[13].mxu1 }
 0x2fd   : > { %v1197_v51 = vpop.f32.mrb[14].mxu1 }
 0x2fe   : > { %v1213_v52 = vsel %vm1208_vm6, %v1210_v43, %v1212_v49  ;;  %v1203_v53 = vsel %vm1201_vm7, %v1202_v48, %v1197_v51  ;;  %v1199_v54 = vpop.f32.mrb[15].mxu1  ;;  %v3536_v43 = vld [vmem:[%s4562_s5 + $0xd0] ss:$8 sps:$4 sm:$0xff]  }
 0x2ff   : > { %v1221_v55 = vmax.f32 %v1189_v41, %v1213_v52  ;;  %v1214_v56 = vrot.slane %v1203_v53, 1  ;;  %v3533_v41 = vld [vmem:[%s4562_s5 + $0xc0] ss:$8 sps:$4 sm:$0xff]   ;;  %v3542_v48 = vld [vmem:[%s4562_s5 + $0xf0] ss:$8 sps:$4 sm:$0xff]  }
 0x300   : > { %v3549_v52 = vld [vmem:[%s4562_s5 + $0x10c] ss:$8 sps:$4 sm:$0xff]  }
 0x301   : > { %v1215_v57 = vsel %vm1208_vm6, %v1212_v49, %v1214_v56  ;;  %v1223_v58 = vmax.f32 %v1197_v51, %v1214_v56  ;;  %v1226_v62 = vpack.c.bf16 %v1221_v55, %v1220_v46  ;;  %v3544_v46 = vld [vmem:[%s4562_s5 + $0xf4] ss:$8 sps:$4 sm:$0xff]   ;;  %v3547_v55 = vld [vmem:[%s4562_s5 + $0x108] ss:$8 sps:$4 sm:$0xff]  }
 0x302   : > { %v1222_v0 = vmax.f32 %v1194_v47, %v1215_v57  ;;  %v3022_v47 = vld [vmem:[%s4562_s5 + $0x100] sm:$0x33] }
 0x303   : > { %3234 = vmatpush3.bf16.msra.mxu0 %v1226_v62  ;;  %v3034_v49 = vcombine.high %v3022_v47, %v3022_v47  ;;  %v3033_v50 = vcombine.low %v3022_v47, %v3022_v47  ;;  %v3552_v57 = vld [vmem:[%s4562_s5 + $0x11c] ss:$8 sps:$4 sm:$0xff]   ;;  %v3555_v62 = vld [vmem:[%s4562_s5 + $0x12c] ss:$8 sps:$4 sm:$0xff]  }
 0x304   : > { %v1227_v1 = vpack.c.bf16 %v1223_v58, %v1222_v0  ;;  %3235 = vmatprep.subr.bf16.mxu0 %v3712_v34  ;;  %v3550_v58 = vld [vmem:[%s4562_s5 + $0x118] ss:$8 sps:$4 sm:$0xff]   ;;  %v3553_v0 = vld [vmem:[%s4562_s5 + $0x128] ss:$8 sps:$4 sm:$0xff]  }
 0x305   : > { %v1620_v51 = vsel %vm1370_vm10, %v3033_v50, 0  ;;  %v3586_v47 = vld [vmem:[%s4564_s7 + $0x28] sm:$0xff]   ;;  %v3589_v50 = vld [vmem:[%s4564_s7 + $0x40] sm:$0xff]  }
 0x306   : > { %v1239_v3 = vsel %vm1237_vm8, %v1227_v1, 0  ;;  %v3558_v1 = vld [vmem:[%s4562_s5 + $0x13c] ss:$8 sps:$4 sm:$0xff]  }
 0x307   : > { %3236 = vmatpush3.bf16.msra.mxu0 %v1239_v3  ;;  %v3556_v3 = vld [vmem:[%s4562_s5 + $0x138] ss:$8 sps:$4 sm:$0xff]  }
 0x308   : > { %2043 = vmatprep.subr.bf16.mxu0 %v3709_v2 }
 0x30a   : > { %3238 = vmatmul.mubr.msk.bf16.vlgmr.msra.gmra.mrb[8].mxu0 %vm1233_vm9, %v3495_v4  ;;  %v3561_v4 = vld [vmem:[%s4562_s5 + $0x14c] ss:$8 sps:$4 sm:$0xff]  }
 0x3dd   : > { %v1275_v14 = vpop.f32.mrb[8].mxu0 }
 0x3de   : > { %1283 = vst.msk [vmem:[#allocation2] sm:$0xff] %vm1282_vm11, %v1275_v14  ;;  %v3239_v17 = vpop.f32.mrb[9].mxu0 }
 0x3df   : > { %v1278_v18 = vpop.f32.mrb[10].mxu0  ;;  %v3569_v17 = vld [vmem:[%s4562_s5 + $0x174] ss:$8 sps:$4 sm:$0xff]  }
 0x3e0   : > { %1285 = vst.msk [vmem:[#allocation2 + $0x8] sm:$0x3f] %vm1284_vm12, %v1278_v18  ;;  %v3240_v19 = vpop.f32.mrb[11].mxu0  ;;  %v3567_v18 = vld [vmem:[%s4562_s5 + $0x170] ss:$8 sps:$4 sm:$0xff]  }
 0x3e1   : > { %v3572_v19 = vld [vmem:[%s4562_s5 + $0x184] ss:$8 sps:$4 sm:$0xff]  }
 0x3e5   : > { %v1286_v21 = vld [vmem:[#allocation2] sm:$0xff] }
 0x3e7   : > { %v1287_v22 = vld [vmem:[#allocation2 + $0x8] sm:$0x3]  ;;  %v1547_v54 = vld [vmem:[#allocation2 + $0xa] sm:$0x3] }
 0x3e8   : > { %v1288_v23 = vpack.c.bf16 %v1287_v22, %v1286_v21  ;;  %v1420_v36 = vld [vmem:[#allocation2 + $0x1] sm:$0xff]  ;;  %v1421_v37 = vld [vmem:[#allocation2 + $0x9] sm:$0x3]  ;;  %v1673_v12 = vld [vmem:[#allocation2 + $0xb] sm:$0x3] }
 0x3e9   : > { %v1422_v39 = vpack.c.bf16 %v1421_v37, %v1420_v36  ;;  %v1546_v53 = vld [vmem:[#allocation2 + $0x2] sm:$0xff]  ;;  %v3575_v21 = vld [vmem:[%s4562_s5 + $0x194] ss:$8 sps:$4 sm:$0xff]   ;;  %v3573_v22 = vld [vmem:[%s4562_s5 + $0x190] ss:$8 sps:$4 sm:$0xff]  }
 0x3ea   : > { %2986 = vmatmul.mubr.msk.bf16.vlgmr.msra.gmra.mrb[16].mxu1 %vm1282_vm11, %v1288_v23  ;;  %v1548_v56 = vpack.c.bf16 %v1547_v54, %v1546_v53  ;;  %v1672_v11 = vld [vmem:[#allocation2 + $0x3] sm:$0xff] }
 0x3eb   : > { %1500 = vmatpush1.bf16.msra.mxu1 %v3513_v20  ;;  %1531 = vmatprep.mubr.bf16.mxu1 %v3709_v2  ;;  %v1674_v14 = vpack.c.bf16 %v1673_v12, %v1672_v11  ;;  %v3570_v20 = vld [vmem:[%s4562_s5 + $0x180] ss:$8 sps:$4 sm:$0xff]   ;;  %v3578_v23 = vld [vmem:[%s4562_s5 + $0x1a4] ss:$8 sps:$4 sm:$0xff]  }
 0x3ec   : > { %1501 = vmatprep.subr.bf16.mxu1 %v3518_v24  ;;  %v3072_v24 = vld [vmem:[%s4562_s5 + $0x1b0] sm:$0x33]  ;;  %v3581_v36 = vld [vmem:[%s4564_s7] sm:$0xff]  }
 0x3ed   : > { %2044 = vmatpush1.bf16.msra.mxu0 %v3581_v36  ;;  %v3593_v36 = vld [vmem:[%s4566_s9 + $0x48] sm:$0xff]  }
 0x3ee   : > { %2045 = vmatprep.subr.bf16.mxu0 %v3709_v2 }
 0x3ef   : > { %1502 = vmatpush1.bf16.msra.mxu1 %v3516_v25  ;;  %v3576_v25 = vld [vmem:[%s4562_s5 + $0x1a0] ss:$8 sps:$4 sm:$0xff]  }
 0x3f0   : > { %1503 = vmatprep.subr.bf16.mxu1 %v3521_v26  ;;  %v3084_v26 = vcombine.high %v3072_v24, %v3072_v24 }
 0x3f3   : > { %1504 = vmatpush1.bf16.msra.mxu1 %v3519_v27  ;;  %v3083_v27 = vcombine.low %v3072_v24, %v3072_v24 }
 0x3f4   : > { %1505 = vmatprep.subr.bf16.mxu1 %v3524_v28 }
 0x3f5   : > { %v1872_v28 = vsel %vm1370_vm10, %v3083_v27, 0 }
 0x3f7   : > { %1506 = vmatpush1.bf16.msra.mxu1 %v3522_v29  ;;  %v1798_v29 = vld [vmem:[#allocation2 + $0x4] sm:$0xff] }
 0x3f8   : > { %1507 = vmatprep.subr.bf16.mxu1 %v3527_v15  ;;  %v1799_v15 = vld [vmem:[#allocation2 + $0xc] sm:$0x3] }
 0x3f9   : > { %v1800_v16 = vpack.c.bf16 %v1799_v15, %v1798_v29 }
 0x3fb   : > { %1508 = vmatpush1.bf16.msra.mxu1 %v3525_v30  ;;  %v1300_v30 = vld [vmem:[%s4563_s6] sm:$0x3] }
 0x3fc   : > { %3010 = vmatprep.subr.msk.bf16.mxu1 %vm1370_vm10, %v3009_v31  ;;  %v1305_v31 = vrot.slane %v1300_v30, %v3957_v61 }
 0x3ff   : > { %1510 = vmatpush1.bf16.msra.mxu1 %v1494_v32 }
 0x400   : > { %1625 = vmatprep.subr.bf16.mxu1 %v3532_v33 }
 0x402   : > { %3011 = vmatmul.mubr.msk.bf16.vlgmr.msra.gmra.mrb[16].mxu1 %vm1282_vm11, %v1422_v39 }
 0x403   : > { %1626 = vmatpush1.bf16.msra.mxu1 %v3530_v38  ;;  %1657 = vmatprep.mubr.bf16.mxu1 %v3709_v2 }
 0x404   : > { %1627 = vmatprep.subr.bf16.mxu1 %v3535_v40  ;;  %v3582_v40 = vld [vmem:[%s4564_s7 + $0x8] sm:$0xff]  }
 0x405   : > { %2046 = vmatpush1.bf16.msra.mxu0 %v3582_v40  ;;  %v3598_v40 = vld [vmem:[%s4566_s9 + $0x108] sm:$0xff]  }
 0x406   : > { %2047 = vmatprep.subr.bf16.mxu0 %v3709_v2 }
 0x407   : > { %1628 = vmatpush1.bf16.msra.mxu1 %v3533_v41 }
 0x408   : > { %1629 = vmatprep.subr.bf16.mxu1 %v3538_v42 }
 0x40b   : > { %1630 = vmatpush1.bf16.msra.mxu1 %v3536_v43 }
 0x40c   : > { %1631 = vmatprep.subr.bf16.mxu1 %v3541_v44  ;;  %v3583_v44 = vld [vmem:[%s4564_s7 + $0x10] sm:$0xff]  }
 0x40d   : > { %2048 = vmatpush1.bf16.msra.mxu0 %v3583_v44  ;;  %v3604_v44 = vld [vmem:[%s4566_s9 + $0x118] sm:$0xff]  }
 0x40e   : > { %2049 = vmatprep.subr.bf16.mxu0 %v3709_v2 }
 0x40f   : > { %1632 = vmatpush1.bf16.msra.mxu1 %v3539_v45  ;;  %v3584_v45 = vld [vmem:[%s4564_s7 + $0x18] sm:$0xff]  }
 0x410   : > { %1633 = vmatprep.subr.bf16.mxu1 %v3544_v46  ;;  %v3585_v46 = vld [vmem:[%s4564_s7 + $0x20] sm:$0xff]  }
 0x411   : > { %2050 = vmatpush1.bf16.msra.mxu0 %v3584_v45  ;;  %v3602_v45 = vld [vmem:[%s4566_s9 + $0x60] sm:$0xff]  }
 0x412   : > { %2051 = vmatprep.subr.bf16.mxu0 %v3709_v2 }
 0x413   : > { %1634 = vmatpush1.bf16.msra.mxu1 %v3542_v48  ;;  %v3587_v48 = vld [vmem:[%s4564_s7 + $0x30] sm:$0xff]  }
 0x414   : > { %3035 = vmatprep.subr.msk.bf16.mxu1 %vm1370_vm10, %v3034_v49  ;;  %v3588_v49 = vld [vmem:[%s4564_s7 + $0x38] sm:$0xff]  }
 0x415   : > { %2052 = vmatpush1.bf16.msra.mxu0 %v3585_v46  ;;  %v3603_v46 = vld [vmem:[%s4566_s9 + $0x20] sm:$0xff]  }
 0x416   : > { %2053 = vmatprep.subr.bf16.mxu0 %v3709_v2 }
 0x417   : > { %1636 = vmatpush1.bf16.msra.mxu1 %v1620_v51  ;;  %v1309_v51 = vrot.slane %v1300_v30, %v3963_v63 }
 0x418   : > { %1751 = vmatprep.subr.bf16.mxu1 %v3549_v52  ;;  %v3590_v52 = vld [vmem:[%s4564_s7 + $0x48] sm:$0xff]  }
 0x419   : > { %2054 = vmatpush1.bf16.msra.mxu0 %v3586_v47  ;;  %v3607_v47 = vld [vmem:[%s4566_s9 + $0x120] sm:$0xff]  }
 0x41a   : > { %3036 = vmatmul.mubr.msk.bf16.vlgmr.msra.gmra.mrb[16].mxu1 %vm1282_vm11, %v1548_v56  ;;  %2055 = vmatprep.subr.bf16.mxu0 %v3709_v2 }
 0x41b   : > { %1752 = vmatpush1.bf16.msra.mxu1 %v3547_v55  ;;  %1783 = vmatprep.mubr.bf16.mxu1 %v3709_v2 }
 0x41c   : > { %1753 = vmatprep.subr.bf16.mxu1 %v3552_v57 }
 0x41d   : > { %2056 = vmatpush1.bf16.msra.mxu0 %v3587_v48  ;;  %v3605_v48 = vld [vmem:[%s4566_s9 + $0x68] sm:$0xff]  }
 0x41e   : > { %2057 = vmatprep.subr.bf16.mxu0 %v3709_v2 }
 0x41f   : > { %1754 = vmatpush1.bf16.msra.mxu1 %v3550_v58 }
 0x420   : > { %1755 = vmatprep.subr.bf16.mxu1 %v3555_v62 }
 0x421   : > { %2058 = vmatpush1.bf16.msra.mxu0 %v3588_v49  ;;  %v3606_v49 = vld [vmem:[%s4566_s9 + $0x28] sm:$0xff]  }
 0x422   : > { %2059 = vmatprep.subr.bf16.mxu0 %v3709_v2 }
 0x423   : > { %1756 = vmatpush1.bf16.msra.mxu1 %v3553_v0 }
 0x424   : > { %1757 = vmatprep.subr.bf16.mxu1 %v3558_v1 }
 0x425   : > { %2060 = vmatpush1.bf16.msra.mxu0 %v3589_v50  ;;  %v3610_v50 = vld [vmem:[%s4566_s9 + $0x128] sm:$0xff]  }
 0x426   : > { %2061 = vmatprep.subr.bf16.mxu0 %v3709_v2 }
 0x427   : > { %1758 = vmatpush1.bf16.msra.mxu1 %v3556_v3 }
 0x428   : > { %1759 = vmatprep.subr.bf16.mxu1 %v3561_v4 }
 0x429   : > { %2062 = vmatpush1.bf16.msra.mxu0 %v3590_v52  ;;  %v3609_v52 = vld [vmem:[%s4566_s9 + $0x30] sm:$0xff]  }
 0x42a   : > { %3241 = vmatprep.subr.bf16.mxu0 %v3712_v34 }
 0x42b   : > { %1760 = vmatpush1.bf16.msra.mxu1 %v3559_v6 }
 0x42c   : > { %3060 = vmatprep.subr.msk.bf16.mxu1 %vm1370_vm10, %v3059_v7 }
 0x42f   : > { %1762 = vmatpush1.bf16.msra.mxu1 %v1746_v9 }
 0x430   : > { %1877 = vmatprep.subr.bf16.mxu1 %v3566_v10 }
 0x432   : > { %3061 = vmatmul.mubr.msk.bf16.vlgmr.msra.gmra.mrb[16].mxu1 %vm1282_vm11, %v1674_v14 }
 0x433   : > { %1878 = vmatpush1.bf16.msra.mxu1 %v3564_v13  ;;  %1909 = vmatprep.mubr.bf16.mxu1 %v3709_v2 }
 0x434   : > { %1879 = vmatprep.subr.bf16.mxu1 %v3569_v17 }
 0x437   : > { %1880 = vmatpush1.bf16.msra.mxu1 %v3567_v18 }
 0x438   : > { %1881 = vmatprep.subr.bf16.mxu1 %v3572_v19 }
 0x43b   : > { %1882 = vmatpush1.bf16.msra.mxu1 %v3570_v20  ;;  %v3595_v20 = vld [vmem:[%s4566_s9 + $0x100] sm:$0xff]  }
 0x43c   : > { %1883 = vmatprep.subr.bf16.mxu1 %v3575_v21 }
 0x43f   : > { %1884 = vmatpush1.bf16.msra.mxu1 %v3573_v22 }
 0x440   : > { %1885 = vmatprep.subr.bf16.mxu1 %v3578_v23 }
 0x443   : > { %1886 = vmatpush1.bf16.msra.mxu1 %v3576_v25 }
 0x444   : > { %3085 = vmatprep.subr.msk.bf16.mxu1 %vm1370_vm10, %v3084_v26 }
 0x447   : > { %1888 = vmatpush1.bf16.msra.mxu1 %v1872_v28 }
 0x448   : > { %3247 = vmatprep.subr.bf16.mxu1 %v3712_v34 }
 0x44a   : > { %3086 = vmatmul.mubr.msk.bf16.vlgmr.msra.gmra.mrb[16].mxu1 %vm1282_vm11, %v1800_v16 }
 0x44b   : > { %3263 = vmatprep.mubr.msk.bf16.mxu1 %vm3713_vm5, %v3712_v34  ;;  %3248 = vmatpush3.bf16.msra.mxu1 %v3595_v20 }
 0x44c   : > { %3249 = vmatprep.subr.bf16.mxu1 %v3712_v34 }
 0x44f   : > { %3250 = vmatpush3.bf16.msra.mxu1 %v3598_v40  ;;  %v3638_v40 = vld [vmem:[%s4568_s11 + $0x38] ss:$0 sps:$4 sm:$0xff]  }
 0x450   : > { %3251 = vmatprep.subr.bf16.mxu1 %v3712_v34 }
 0x51d   : > { %v1911_v35 = vpop.f32.mrb[16].mxu1 }
 0x51e   : > { %v3319_v32 = vadd.f32 %v1911_v35, %v1305_v31  ;;  %v1913_v33 = vpop.f32.mrb[17].mxu1 }
 0x51f   : > { %v1915_v37 = vpop.f32.mrb[18].mxu1  ;;  %v3320_v53 = vadd.f32 %v1913_v33, %v1309_v51  ;;  %v3592_v33 = vld [vmem:[%s4566_s9] sm:$0xff]  }
 0x520   : > { %v3321_v38 = vadd.f32 %v1915_v37, %v1305_v31  ;;  %v1917_v39 = vpop.f32.mrb[19].mxu1  ;;  %v1924_v41 = vmax.f32 %v3319_v32, 0.0  ;;  %v3591_v31 = vld [vmem:[%s4566_s9 + $0x40] sm:$0xff]   ;;  %v3594_v37 = vld [vmem:[%s4566_s9 + $0x8] sm:$0xff]  }
 0x521   : > { %v3322_v54 = vadd.f32 %v1917_v39, %v1309_v51  ;;  %v1925_v56 = vmax.f32 %v3320_v53, 0.0  ;;  %v2096_v32 = vld [vmem:[%s4565_s8] sm:$0x7]  ;;  %v3597_v39 = vld [vmem:[%s4566_s9 + $0x10] sm:$0xff]  }
 0x522   : > { %v1926_v42 = vmax.f32 %v3321_v38, 0.0  ;;  %v3596_v38 = vld [vmem:[%s4566_s9 + $0x50] sm:$0xff]  }
 0x523   : > { %v1927_v57 = vmax.f32 %v3322_v54, 0.0  ;;  %v3608_v51 = vld [vmem:[%s4566_s9 + $0x70] sm:$0xff]   ;;  %v3611_v54 = vld [vmem:[%s4566_s9 + $0x78] sm:$0xff]  }
 0x524   : > { %v3439_v43 = vpack.i.bf16 %v1926_v42, %v1924_v41  ;;  %v3613_v53 = vld [vmem:[%s4566_s9 + $0x130] sm:$0xff]  }
 0x526   : > { %3440 = vrot.lane.b32.xlu0 %v3439_v43, %s3714_s30  ;;  %v3600_v43 = vld [vmem:[%s4566_s9 + $0x18] sm:$0xff]   ;;  %s3651_s30 = scalar_lea.vmem %s3650_s26, 32 }
 0x527   : > { %p3653_p1 = scmp.lt.s32.totalorder %s3651_s30, %s3645_s22 }
 0x529   : > { %p3654_p2 = por %p3653_p1, %p3652_p0 }
 0x52b   : > { %p3655_p3 = pnand %p3654_p2, %p3648_p13 }
 0x598   : > { %v3441_v55 = vpop.permute.xlu0 %3440 }
 0x599   : > { %v3443_v58 = vunpack.i.h.bf16 %v3441_v55  ;;  %v3442_v62 = vunpack.i.l.bf16 %v3441_v55  ;;  %v3612_v55 = vld [vmem:[%s4566_s9 + $0x38] sm:$0xff]  }
 0x59b   : > { %v1933_v0 = vsel %vm1928_vm13, %v3442_v62, %v1925_v56  ;;  %v1934_v1 = vsel %vm1928_vm13, %v3443_v58, %v1927_v57 }
 0x59c   : > { %v3444_v3 = vpack.i.bf16 %v1933_v0, %v1924_v41  ;;  %v3449_v4 = vpack.i.bf16 %v1934_v1, %v1926_v42 }
 0x59e   : > { %3445 = vrot.lane.b32.xlu1 %v3444_v3, %s3715_s29  ;;  %3450 = vrot.lane.b32.xlu0 %v3449_v4, %s3715_s29 }
 0x610   : > { %v3446_v2 = vpop.permute.xlu1 %3445  ;;  %v3451_v5 = vpop.permute.xlu0 %3450 }
 0x611   : > { %v3448_v6 = vunpack.i.h.bf16 %v3446_v2  ;;  %v3447_v7 = vunpack.i.l.bf16 %v3446_v2  ;;  %v3453_v8 = vunpack.i.h.bf16 %v3451_v5  ;;  %v3452_v9 = vunpack.i.l.bf16 %v3451_v5 }
 0x613   : > { %v1955_v10 = vmax.f32 %v1925_v56, %v3448_v6  ;;  %v1948_v11 = vsel %vm1947_vm14, %v3447_v7, %v3448_v6  ;;  %v1957_v12 = vmax.f32 %v1927_v57, %v3453_v8  ;;  %v1949_v13 = vsel %vm1947_vm14, %v3452_v9, %v3453_v8  ;;  %v3616_v56 = vld [vmem:[%s4566_s9 + $0x138] sm:$0xff]   ;;  %v3614_v57 = vld [vmem:[%s4566_s9 + $0xc0] sm:$0xff]  }
 0x614   : > { %v1954_v14 = vmax.f32 %v1924_v41, %v1948_v11  ;;  %v1956_v17 = vmax.f32 %v1926_v42, %v1949_v13  ;;  %v3601_v41 = vld [vmem:[%s4566_s9 + $0x110] sm:$0xff]   ;;  %v3599_v42 = vld [vmem:[%s4566_s9 + $0x58] sm:$0xff]   ;;  %v2181_v7 = vsub.s32 4, %v3954_v60  ;;  %v2177_v8 = vsub.s32 3, %v3954_v60 }
 0x615   : > { %v1959_v18 = vpack.c.bf16 %v1957_v12, %v1955_v10  ;;  %3252 = vmatpush3.bf16.msra.mxu1 %v3601_v41  ;;  %v2702_v41 = vsel %vm1148_vm2, %v3638_v40, 0  ;;  %vm2697_vm2 = vcmask 982016  }
 0x616   : > { %v1958_v19 = vpack.c.bf16 %v1956_v17, %v1954_v14  ;;  %3253 = vmatprep.subr.bf16.mxu1 %v3712_v34  ;;  %v3615_v17 = vld [vmem:[%s4566_s9 + $0x80] sm:$0xff]  }
 0x617   : > { %3097 = vmatprep.mubr.msk.bf16.mxu0 %vm535_vm0, %v1959_v18  ;;  %vm2102_vm0 = vcmask 1044480  }
 0x618   : > { %2076 = vmatmul.mubr.bf16.vlgmr.msra.gmra.mrb[12].mxu0 %v1958_v19  ;;  %v3617_v19 = vld [vmem:[%s4566_s9 + $0xc8] sm:$0xff]  }
 0x619   : > { %3243 = vmatprep.mubr.msk.bf16.mxu0 %vm3713_vm5, %v3712_v34  ;;  %3254 = vmatpush3.bf16.msra.mxu1 %v3604_v44  ;;  %v3641_v44 = vld [vmem:[%s4570_s13 + $0x10] sm:$0xff]  }
 0x61a   : > { %3255 = vmatprep.subr.bf16.mxu1 %v3712_v34 }
 0x61d   : > { %3256 = vmatpush3.bf16.msra.mxu1 %v3607_v47 }
 0x61e   : > { %3257 = vmatprep.subr.bf16.mxu1 %v3712_v34 }
 0x621   : > { %3258 = vmatpush3.bf16.msra.mxu1 %v3610_v50 }
 0x622   : > { %3259 = vmatprep.subr.bf16.mxu1 %v3712_v34 }
 0x625   : > { %3260 = vmatpush3.bf16.msra.mxu1 %v3613_v53 }
 0x626   : > { %3261 = vmatprep.subr.bf16.mxu1 %v3712_v34 }
 0x629   : > { %3262 = vmatpush3.bf16.msra.mxu1 %v3616_v56 }
 0x62a   : > { %3287 = vmatprep.subr.bf16.mxu1 %v3712_v34 }
 0x6eb   : > { %v2077_v21 = vpop.f32.mrb[12].mxu0 }
 0x6ec   : > { %v2085_v22 = vrot.slane %v2077_v21, 6  ;;  %v2079_v23 = vpop.f32.mrb[13].mxu0  ;;  %v2089_v27 = vrot.slane %v2077_v21, 1 }
 0x6ed   : > { %v2080_v24 = vpop.f32.mrb[14].mxu0  ;;  %v3622_v23 = vld [vmem:[%s4566_s9 + $0x98] sm:$0xff]  }
 0x6ee   : > { %v2086_v25 = vsel %vm2084_vm15, %v2085_v22, %v2080_v24  ;;  %v2082_v26 = vpop.f32.mrb[15].mxu0  ;;  %v3621_v22 = vld [vmem:[%s4566_s9 + $0xd8] sm:$0xff]  }
 0x6ef   : > { %v2090_v28 = vrot.slane %v2086_v25, 1  ;;  %v3624_v25 = vld [vmem:[%s4566_s9 + $0xa0] sm:$0xff]   ;;  %v3625_v26 = vld [vmem:[%s4566_s9 + $0xe8] sm:$0xff]  }
 0x6f1   : > { %v2091_v29 = vsel %vm1208_vm6, %v2089_v27, %v2090_v28  ;;  %v2095_v15 = vmax.f32 %v2080_v24, %v2090_v28  ;;  %v3623_v24 = vld [vmem:[%s4566_s9 + $0xe0] sm:$0xff]   ;;  %v3626_v27 = vld [vmem:[%s4566_s9 + $0xa8] sm:$0xff]   ;;  %v3627_v28 = vld [vmem:[%s4566_s9 + $0xf0] sm:$0xff]  }
 0x6f2   : > { %v2094_v16 = vmax.f32 %v2077_v21, %v2091_v29  ;;  %v3620_v21 = vld [vmem:[%s4566_s9 + $0x90] sm:$0xff]  }
 0x6f3   : > { %v3628_v29 = vld [vmem:[%s4566_s9 + $0xb0] sm:$0xff]  }
 0x6f4   : > { %v2097_v30 = vpack.c.bf16 %v2095_v15, %v2094_v16  ;;  %v3629_v15 = vld [vmem:[%s4566_s9 + $0xf8] sm:$0xff]   ;;  %v2173_v16 = vsub.s32 2, %v3954_v60  ;;  %v3632_v60 = vld [vmem:[%s4568_s11 + $0x8] sm:$0xff]  }
 0x6f6   : > { %v2104_v35 = vsel %vm2102_vm0, %v2097_v30, 0  ;;  %v3630_v30 = vld [vmem:[%s4566_s9 + $0xb8] sm:$0xff]  }
 0x6f7   : > { %3242 = vmatpush3.bf16.msra.mxu0 %v2104_v35 }
 0x6f8   : > { %3164 = vmatprep.subr.bf16.mxu0 %v3591_v31 }
 0x6fa   : > { %3244 = vmatmul.mubr.msk.bf16.vlgmr.msra.gmra.mrb[16].mxu0 %vm2098_vm1, %v2096_v32  ;;  %v3631_v32 = vld [vmem:[%s4568_s11] sm:$0xff]  }
 0x6fb   : > { %3165 = vmatpush3.bf16.msra.mxu0 %v3592_v33  ;;  %v3633_v33 = vld [vmem:[%s4568_s11 + $0x10] sm:$0xff]  }
 0x6fc   : > { %3166 = vmatprep.subr.bf16.mxu0 %v3593_v36  ;;  %v3634_v36 = vld [vmem:[%s4568_s11 + $0x18] sm:$0xff]  }
 0x6ff   : > { %3167 = vmatpush3.bf16.msra.mxu0 %v3594_v37  ;;  %v3635_v37 = vld [vmem:[%s4568_s11 + $0x20] sm:$0xff]  }
 0x700   : > { %3168 = vmatprep.subr.bf16.mxu0 %v3596_v38  ;;  %v3636_v38 = vld [vmem:[%s4568_s11 + $0x28] sm:$0xff]  }
 0x703   : > { %3169 = vmatpush3.bf16.msra.mxu0 %v3597_v39  ;;  %v3637_v39 = vld [vmem:[%s4568_s11 + $0x30] sm:$0xff]  }
 0x704   : > { %3170 = vmatprep.subr.bf16.mxu0 %v3599_v42  ;;  %v3639_v42 = vld [vmem:[%s4570_s13] sm:$0xff]  }
 0x707   : > { %3171 = vmatpush3.bf16.msra.mxu0 %v3600_v43  ;;  %v3640_v43 = vld [vmem:[%s4570_s13 + $0x8] sm:$0xff]  }
 0x708   : > { %3172 = vmatprep.subr.bf16.mxu0 %v3602_v45  ;;  %v3642_v45 = vld [vmem:[%s4570_s13 + $0x18] sm:$0xff]  }
 0x70b   : > { %3173 = vmatpush3.bf16.msra.mxu0 %v3603_v46 }
 0x70c   : > { %3174 = vmatprep.subr.bf16.mxu0 %v3605_v48 }
 0x70f   : > { %3175 = vmatpush3.bf16.msra.mxu0 %v3606_v49 }
 0x710   : > { %3176 = vmatprep.subr.bf16.mxu0 %v3608_v51 }
 0x713   : > { %3177 = vmatpush3.bf16.msra.mxu0 %v3609_v52 }
 0x714   : > { %3178 = vmatprep.subr.bf16.mxu0 %v3611_v54 }
 0x717   : > { %3179 = vmatpush3.bf16.msra.mxu0 %v3612_v55  ;;  %v2273_v55 = vld [vmem:[%s4567_s10] sm:$0x1] }
 0x718   : > { %3186 = vmatprep.subr.bf16.mxu0 %v3614_v57 }
 0x7cd   : > { %v2140_v58 = vpop.f32.mrb[16].mxu0 }
 0x7ce   : > { %2146 = vst [vmem:[#allocation3] sm:$0x1f] %v2140_v58  ;;  %v3245_v62 = vpop.f32.mrb[17].mxu0 }
 0x7cf   : > { %v2143_v0 = vpop.f32.mrb[18].mxu0 }
 0x7d0   : > { %v3246_v1 = vpop.f32.mrb[19].mxu0 }
 0x7d5   : > { %v2147_v3 = vld [vmem:[#allocation3] sm:$0x1]  ;;  %v2153_v4 = vld [vmem:[#allocation3 + $0x1] sm:$0x1]  ;;  %v2155_v2 = vld [vmem:[#allocation3 + $0x2] sm:$0x1] }
 0x7d6   : > { %2152 = vst.msk [vmem:[#allocation4] sm:$0x1] %vm2150_vm3, %v2147_v3  ;;  %2154 = vst.msk [vmem:[#allocation4 + $0x1] sm:$0x1] %vm2150_vm3, %v2153_v4  ;;  %v2157_v5 = vld [vmem:[#allocation3 + $0x3] sm:$0x1] }
 0x7d7   : > { %2156 = vst.msk [vmem:[#allocation4 + $0x2] sm:$0x1] %vm2150_vm3, %v2155_v2  ;;  %v2159_v6 = vld [vmem:[#allocation3 + $0x4] sm:$0x1]  ;;  %2158 = vst.msk [vmem:[#allocation4 + $0x3] sm:$0x1] %vm2150_vm3, %v2157_v5 }
 0x7d8   : > { %2160 = vst.msk [vmem:[#allocation4 + $0x4] sm:$0x1] %vm2150_vm3, %v2159_v6  ;;  %v3643_v6 = vld [vmem:[%s4570_s13 + $0x20] sm:$0xff]  }
 0x7df   : > { %v2161_v9 = vld [vmem:[#allocation4] sm:$0x1f] }
 0x7e0   : > { %v2170_v10 = vrot.slane %v2161_v9, %v3963_v63  ;;  %v2166_v11 = vrot.slane %v2161_v9, %v3957_v61  ;;  %v2182_v59 = vrot.slane %v2161_v9, %v2181_v7  ;;  %v2178_v12 = vrot.slane %v2161_v9, %v2177_v8  ;;  %v3618_v61 = vld [vmem:[%s4566_s9 + $0x88] sm:$0xff]   ;;  %v3619_v63 = vld [vmem:[%s4566_s9 + $0xd0] sm:$0xff]  }
 0x7e1   : > { %v2174_v31 = vrot.slane %v2161_v9, %v2173_v16  ;;  %v3644_v7 = vld [vmem:[%s4570_s13 + $0x28] ss:$0 sps:$4 sm:$0x33]   ;;  %v2651_v9 = vld [vmem:[%s4569_s12] sm:$0x1] }
 0x7e2   : > { %v2189_v13 = vpack.c.bf16 %v2170_v10, %v2170_v10  ;;  %v2188_v14 = vpack.c.bf16 %v2166_v11, %v2166_v11  ;;  %v2192_v18 = vpack.c.bf16 %v2182_v59, %v2182_v59  ;;  %v2191_v20 = vpack.c.bf16 %v2178_v12, %v2178_v12 }
 0x7e3   : > { %v2190_v35 = vpack.c.bf16 %v2174_v31, %v2174_v31  ;;  %v2795_v8 = vsel %vm1370_vm10, %v3644_v7, 0 }
 0x7e4   : > { %2546 = vmatprep.mubr.bf16.mxu0 %v2189_v13  ;;  %3264 = vmatmul.mubr.bf16.vlgmr.msra.gmra.mrb[20].mxu1 %v2192_v18 }
 0x7e5   : > { %2547 = vmatmul.mubr.bf16.vlgmr.msra.gmra.mrb[20].mxu0 %v2188_v14  ;;  %3299 = vmatprep.mubr.msk.bf16.mxu1 %vm3713_vm5, %v3712_v34 }
 0x7e6   : > { %3187 = vmatpush3.bf16.msra.mxu0 %v3615_v17  ;;  %2586 = vmatprep.mubr.bf16.mxu0 %v2191_v20 }
 0x7e7   : > { %3188 = vmatprep.subr.bf16.mxu0 %v3617_v19  ;;  %3288 = vmatpush3.bf16.msra.mxu1 %v3639_v42 }
 0x7e8   : > { %3289 = vmatprep.subr.bf16.mxu1 %v3712_v34 }
 0x7ea   : > { %3189 = vmatpush3.bf16.msra.mxu0 %v3618_v61 }
 0x7eb   : > { %3190 = vmatprep.subr.bf16.mxu0 %v3619_v63  ;;  %3290 = vmatpush3.bf16.msra.mxu1 %v3640_v43 }
 0x7ec   : > { %3291 = vmatprep.subr.bf16.mxu1 %v3712_v34 }
 0x7ee   : > { %3191 = vmatpush3.bf16.msra.mxu0 %v3620_v21 }
 0x7ef   : > { %3192 = vmatprep.subr.bf16.mxu0 %v3621_v22  ;;  %3292 = vmatpush3.bf16.msra.mxu1 %v3641_v44 }
 0x7f0   : > { %3293 = vmatprep.subr.bf16.mxu1 %v3712_v34 }
 0x7f2   : > { %3193 = vmatpush3.bf16.msra.mxu0 %v3622_v23 }
 0x7f3   : > { %3194 = vmatprep.subr.bf16.mxu0 %v3623_v24  ;;  %3294 = vmatpush3.bf16.msra.mxu1 %v3642_v45 }
 0x7f4   : > { %3295 = vmatprep.subr.bf16.mxu1 %v3712_v34 }
 0x7f6   : > { %3195 = vmatpush3.bf16.msra.mxu0 %v3624_v25 }
 0x7f7   : > { %3196 = vmatprep.subr.bf16.mxu0 %v3625_v26  ;;  %3296 = vmatpush3.bf16.msra.mxu1 %v3643_v6 }
 0x7f8   : > { %3297 = vmatprep.subr.bf16.mxu1 %v3712_v34 }
 0x7fa   : > { %3197 = vmatpush3.bf16.msra.mxu0 %v3626_v27 }
 0x7fb   : > { %3198 = vmatprep.subr.bf16.mxu0 %v3627_v28  ;;  %3298 = vmatpush3.bf16.msra.mxu1 %v2795_v8 }
 0x7fe   : > { %3199 = vmatpush3.bf16.msra.mxu0 %v3628_v29 }
 0x7ff   : > { %3200 = vmatprep.subr.bf16.mxu0 %v3629_v15 }
 0x802   : > { %3201 = vmatpush3.bf16.msra.mxu0 %v3630_v30 }
 0x803   : > { %3267 = vmatprep.subr.bf16.mxu0 %v3712_v34 }
 0x805   : > { %2587 = vmatmul.mubr.bf16.vlgmr.msra.gmra.mrb[24].mxu0 %v2190_v35 }
 0x806   : > { %3283 = vmatprep.mubr.msk.bf16.mxu0 %vm3713_vm5, %v3712_v34  ;;  %3268 = vmatpush3.bf16.msra.mxu0 %v3631_v32 }
 0x807   : > { %3269 = vmatprep.subr.bf16.mxu0 %v3712_v34 }
 0x80a   : > { %3270 = vmatpush3.bf16.msra.mxu0 %v3632_v60 }
 0x80b   : > { %3271 = vmatprep.subr.bf16.mxu0 %v3712_v34 }
 0x80e   : > { %3272 = vmatpush3.bf16.msra.mxu0 %v3633_v33 }
 0x80f   : > { %3273 = vmatprep.subr.bf16.mxu0 %v3712_v34 }
 0x812   : > { %3274 = vmatpush3.bf16.msra.mxu0 %v3634_v36 }
 0x813   : > { %3275 = vmatprep.subr.bf16.mxu0 %v3712_v34 }
 0x816   : > { %3276 = vmatpush3.bf16.msra.mxu0 %v3635_v37 }
 0x817   : > { %3277 = vmatprep.subr.bf16.mxu0 %v3712_v34 }
 0x81a   : > { %3278 = vmatpush3.bf16.msra.mxu0 %v3636_v38 }
 0x81b   : > { %3279 = vmatprep.subr.bf16.mxu0 %v3712_v34 }
 0x81e   : > { %3280 = vmatpush3.bf16.msra.mxu0 %v3637_v39 }
 0x81f   : > { %3281 = vmatprep.subr.bf16.mxu0 %v3712_v34  ;;  %v2757_v34 = vld [vmem:[%s4571_s14] sm:$0x1] }
 0x822   : > { %3282 = vmatpush3.bf16.msra.mxu0 %v2702_v41 }
 0x8b7   : > { %v2628_v46 = vpop.f32.mrb[20].mxu1 }
 0x8b8   : > { %v3180_v47 = vpop.f32.mrb[20].mxu0  ;;  %v3265_v48 = vpop.f32.mrb[21].mxu1 }
 0x8b9   : > { %v3181_v49 = vpop.f32.mrb[21].mxu0  ;;  %v2631_v50 = vpop.f32.mrb[22].mxu1 }
 0x8ba   : > { %v3182_v51 = vadd.f32 %v3181_v49, %v3180_v47  ;;  %v3183_v52 = vpop.f32.mrb[22].mxu0  ;;  %v3266_v53 = vpop.f32.mrb[23].mxu1 }
 0x8bb   : > { %v3184_v54 = vpop.f32.mrb[23].mxu0 }
 0x8bc   : > { %v2549_v58 = vadd.f32 %v3182_v51, %v2273_v55 }
 0x8d8   : > { %v3202_v56 = vpop.f32.mrb[24].mxu0 }
 0x8d9   : > { %v3203_v57 = vpop.f32.mrb[25].mxu0 }
 0x8da   : > { %v3204_v62 = vadd.f32 %v3203_v57, %v3202_v56  ;;  %v3205_v0 = vpop.f32.mrb[26].mxu0 }
 0x8db   : > { %v3206_v1 = vpop.f32.mrb[27].mxu0 }
 0x8dc   : > { %v2589_v3 = vadd.f32 %v3204_v62, %v2549_v58 }
 0x8de   : > { %v2629_v4 = vadd.f32 %v2628_v46, %v2589_v3 }
 0x8e0   : > { %v2634_v2 = vmax.f32 %v2629_v4, 0.0 }
 0x8e2   : > { %v2635_v5 = vpack.c.bf16 %v2634_v2, %v2634_v2 }
 0x8e4   : > { %3284 = vmatmul.mubr.msk.bf16.vlgmr.msra.gmra.mrb[28].mxu0 %vm2697_vm2, %v2635_v5 }
 0x9b7   : > { %v2738_v10 = vpop.f32.mrb[28].mxu0 }
 0x9b8   : > { %v2739_v11 = vadd.f32 %v2738_v10, %v2651_v9  ;;  %v3285_v59 = vpop.f32.mrb[29].mxu0 }
 0x9b9   : > { %v2741_v12 = vpop.f32.mrb[30].mxu0 }
 0x9ba   : > { %v2744_v13 = vmax.f32 %v2739_v11, 0.0  ;;  %v3286_v14 = vpop.f32.mrb[31].mxu0 }
 0x9bc   : > { %v2745_v17 = vpack.c.bf16 %v2744_v13, %v2744_v13 }
 0x9be   : > { %3300 = vmatmul.mubr.msk.bf16.vlgmr.msra.gmra.mrb[24].mxu1 %vm1282_vm11, %v2745_v17 }
 0xa91   : > { %v2831_v18 = vpop.f32.mrb[24].mxu1 }
 0xa92   : > { %v2832_v19 = vadd.f32 %v2831_v18, %v2757_v34  ;;  %v3301_v20 = vpop.f32.mrb[25].mxu1 }
 0xa93   : > { %v2834_v61 = vpop.f32.mrb[26].mxu1 }
 0xa94   : > { %2837 = vst [vmem:[%s486_s20] sm:$0x1] %v2832_v19  ;;  %v3302_v63 = vpop.f32.mrb[27].mxu1 }
 0xa95   : > { %3658 = shalt.err (!%p3655_p3)
}
 0xa96   : > { %s3659_s25 = scalar_lea.hbm %s4515_s17, 16  ;;  %s3663_s29 = scalar_lea.hbm %s4572_s15, 32 }
 0xa97   : > { %p3660_p4 = scmp.ne.s32.totalorder %s4515_s17, %s3659_s25  ;;  %p3664_p9 = scmp.lt.u32.totalorder %s4515_s17, %s4572_s15 }
 0xa98   : > { %p3665_p10 = scmp.lt.u32.totalorder %s3663_s29, %s3659_s25  ;;  %p3667_p12 = scmp.lt.u32.totalorder %s3659_s25, %s4515_s17 }
 0xa99   : > { %p3661_p7 = pnand %p3660_p4, %p3835_p5 }
 0xa9a   : > { %p3666_p11 = por %p3665_p10, %p3664_p9 }
 0xa9b   : > { %p3662_p8 = pneg %p3661_p7 }
 0xa9c   : > { %p3668_p13 = por %p3667_p12, %p3666_p11 }
 0xa9e   : > { %p3669_p0 = pnand %p3668_p13, %p3662_p8 }
 0xaa0   : > { %3672 = shalt.err (!%p3669_p0)
}
 0xaa1   : > { %3363 = dma.vmem_to_hbm [thread:$0]  (%p3835_p5), %s4517_s24, 16, %s4515_s17, %s2839_s23  }
 0xaa2 PF: > { %s4585_s22 = sld [smem:[#allocation8_spill]]  ;;  %p3369_p1 = scmp.ge.s32.totalorder %s3707_s21, 2 }
 0xaa4   : > { %p3366_p2 = pnand %p3369_p1, %p3839_p6 }
 0xaa8   : > { %s2863_s30 = sand.u32 1, %s4585_s22  }
 0xaa9   : > { %s2864_s27 = scalar_lea.sflag [#allocation6], %s2863_s30 }
 0xaaa   : > { %3690 = dma.done.wait (!%p3366_p2), %s2864_s27, 16  }
 0xaab   : > { %3692 = vsyncadd (!%p3366_p2), %s2864_s27, 4294967280  ;;  %s4587_s21 = sld [smem:[#allocation10_spill]]  ;;  %s4588_s25 = sld [smem:[#allocation9_spill]] }
 0xaac   : > { %s4589_s20 = sld [smem:[#allocation11_spill]]  ;;  %s4590_s18 = smov %s3699_s19 }
 0xab1   : > { %p25_p3 = scmp.ge.s32.totalorder %s4587_s21, 4   ;;  %s4591_s19 = smov %s4588_s25 }
 0xab3   :  { %27 = sbr.rel (!%p25_p3) target bundleno = 3 (0x3), region = 123 }
 0xaba   :  { %2868 = vsyncpa [#allocation6], 1 }
 0xabb   :  { %2870 = vsyncpa [#allocation6 + $0x1], 1 }

</bundles_post_ra>
